<compile_context>
chip_gen: v7x
topology: tpu7x:2x2x1
jax: 0.10.0
libtpu: 0.0.40
codegen_flags: <defaults>
</compile_context>

<pallas_src>
import jax
import jax.numpy as jnp
from jax.experimental import pallas as pl
from jax.experimental.pallas import tpu as pltpu

_R = 128  # original rows packed per output lane-row (=> lane-dense (tile, 128) output)


def _squeeze_head_kernel(x_ref, wb_ref, b_ref, o_ref):
    # x_ref : (T, 128*H)   packed rows: lane r*H + h = feature h of original row 128*q + r
    # wb_ref: (128*H, 128) block-diagonal weight: column r = w in rows r*H .. r*H+H-1
    # b_ref : (1, 1)       bias scalar in SMEM
    # o_ref : (T, 128)     lane-dense: o[q, r] = y[128*q + r]
    acc = jnp.dot(x_ref[...], wb_ref[...], preferred_element_type=jnp.float32)
    o_ref[...] = (acc + b_ref[0, 0]).astype(o_ref.dtype)


def _round_up(a, m):
    return ((a + m - 1) // m) * m


def squeeze_end_linear(x, w, b, *, tp=512):
    """Computes Linear(H,1)(x).squeeze(-1): (..., H) -> (...).

    tp = packed rows per grid step; the streamed x block is tp * 128*H * 4 bytes
    (tp=512, H=32 -> 8 MiB).
    """
    lead = x.shape[:-1]
    H = x.shape[-1]
    assert H <= 128, "resident block-diagonal weight is sized for H <= 128"
    M = 1
    for d in lead:
        M *= d

    x2 = x.reshape(M, H)

    # Pack 128 original rows per 128-lane output row.  Keep at least 8 packed rows so
    # every block is (8,128)-aligned; pad only when needed (ragged tail / tiny input) —
    # the common large case (M % 1024 == 0) pads nothing.
    Mq = max(pl.cdiv(M, _R), 8)
    M_pad = Mq * _R
    if M_pad != M:
        x2 = jnp.pad(x2, ((0, M_pad - M), (0, 0)))
    xp = x2.reshape(Mq, _R * H)  # row-major: xp[q, r*H + h] = x2[128*q + r, h]

    # Block-diagonal weight: out[q, r] = sum_h xp[q, r*H + h] * w[h].
    wb = jnp.kron(jnp.eye(_R, dtype=x.dtype), w.reshape(H, 1).astype(x.dtype))
    b2 = jnp.asarray(b, jnp.float32).reshape(1, 1)

    # Row tiling: large blocks amortize the ~0.35 us per-step cost; when tiling, keep
    # tiles 8-sublane aligned and aim for >= 8 grid steps (v7x dual-TC balance).
    if Mq <= tp:
        tpe = Mq  # single full-extent block
    else:
        tpe = max(8, min(_round_up(tp, 8), _round_up(pl.cdiv(Mq, 8), 8)))
    grid = (pl.cdiv(Mq, tpe),)

    out = pl.pallas_call(
        _squeeze_head_kernel,
        out_shape=jax.ShapeDtypeStruct((Mq, _R), x.dtype),
        grid=grid,
        in_specs=[
            pl.BlockSpec((tpe, _R * H), lambda i: (i, 0)),       # x, streamed
            pl.BlockSpec((_R * H, _R), lambda i: (0, 0)),        # weight, resident
            pl.BlockSpec(memory_space=pltpu.MemorySpace.SMEM),   # bias scalar
        ],
        out_specs=pl.BlockSpec((tpe, _R), lambda i: (i, 0)),     # lane-dense y slab
        compiler_params=pltpu.CompilerParams(
            dimension_semantics=("parallel",),   # shard row tiles across TCs (v7x)
            vmem_limit_bytes=32 * 1024 * 1024,   # 2x8MiB x + 2x2MiB wb + out < 32 MiB
        ),
    )(xp, wb, b2)

    # squeeze(-1): row-major flatten of the lane-dense output IS y (free), then drop
    # pad rows and restore the leading shape.
    return out.reshape(-1)[:M].reshape(lead)


if __name__ == "__main__":
    key = jax.random.PRNGKey(0)
    kx, kw, kb = jax.random.split(key, 3)

    B, S, H = 2, 8, 32
    x = jax.random.normal(kx, (B, S, H), dtype=jnp.float32)
    # Deterministic synthetic "Linear(H, 1)" parameters (no checkpoint).
    w = jax.random.normal(kw, (H,), dtype=jnp.float32) / jnp.sqrt(float(H))
    b = jax.random.normal(kb, (), dtype=jnp.float32)

    y = jax.block_until_ready(squeeze_end_linear(x, w, b))

    # Reference: PyTorch semantics of model(x).squeeze(-1) with model = Linear(H, 1).
    y_ref = (x.reshape(-1, H) @ w.reshape(H, 1) + b).reshape(B, S)
    assert y.shape == (B, S)
    assert jnp.allclose(y, y_ref, atol=1e-4, rtol=1e-4)

    print("KERNEL_OK")
</pallas_src>

<mosaic_0001>
module attributes {stable_mosaic.version = 11 : i64} {
  func.func @_squeeze_head_kernel(%arg0: i32, %arg1: memref<8x4096xf32, #tpu.memory_space<vmem>>, %arg2: memref<4096x128xf32, #tpu.memory_space<vmem>>, %arg3: memref<1x1xf32, #tpu.memory_space<smem>>, %arg4: memref<8x128xf32, #tpu.memory_space<vmem>>) attributes {dimension_semantics = [#tpu.dimension_semantics<parallel>], iteration_bounds = array<i64: 1>, scalar_prefetch = 0 : i64, scratch_operands = 0 : i64, tpu.core_type = #tpu.core_type<tc>, window_params = [{transform_indices = @transform_0, window_bounds = array<i64: 8, 4096>}, {pipeline_mode = #tpu.pipeline_mode<synchronous>, transform_indices = @transform_1, window_bounds = array<i64: 4096, 128>}, {transform_indices = @transform_2, window_bounds = array<i64: 1, 1>}, {transform_indices = @transform_3, window_bounds = array<i64: 8, 128>}]} {
    %c0 = arith.constant 0 : index
    %c0_0 = arith.constant 0 : index
    %0 = vector.load %arg1[%c0, %c0_0] : memref<8x4096xf32, #tpu.memory_space<vmem>>, vector<8x4096xf32>
    %c0_1 = arith.constant 0 : index
    %c0_2 = arith.constant 0 : index
    %1 = vector.load %arg2[%c0_1, %c0_2] : memref<4096x128xf32, #tpu.memory_space<vmem>>, vector<4096x128xf32>
    %cst = arith.constant dense<0.000000e+00> : vector<8x128xf32>
    %2 = tpu.matmul %0, %1, %cst {dimension_numbers = #tpu.dot_dimension_numbers<[1], [0], [0], [1], [0, 0, 1, 1], [], []>} : vector<8x4096xf32>, vector<4096x128xf32>, vector<8x128xf32> -> vector<8x128xf32>
    %c0_3 = arith.constant 0 : index
    %c0_4 = arith.constant 0 : index
    %3 = memref.load %arg3[%c0_3, %c0_4] : memref<1x1xf32, #tpu.memory_space<smem>>
    %4 = vector.broadcast %3 : f32 to vector<8x128xf32>
    %5 = arith.addf %2, %4 : vector<8x128xf32>
    %c0_5 = arith.constant 0 : index
    %c0_6 = arith.constant 0 : index
    %6 = vector.load %arg4[%c0_5, %c0_6] : memref<8x128xf32, #tpu.memory_space<vmem>>, vector<8x128xf32>
    tpu.vector_store %arg4[%c0_5, %c0_6], %5 {strides = array<i32>} : memref<8x128xf32, #tpu.memory_space<vmem>>, vector<8x128xf32>,
    return
  }
  func.func @transform_0(%arg0: i32) -> (i32, i32) {
    %c0_i32 = arith.constant 0 : i32
    %c0_i32_0 = arith.constant 0 : i32
    return %arg0, %c0_i32 : i32, i32
  }
  func.func @transform_1(%arg0: i32) -> (i32, i32) {
    %c0_i32 = arith.constant 0 : i32
    %c0_i32_0 = arith.constant 0 : i32
    %c0_i32_1 = arith.constant 0 : i32
    return %c0_i32, %c0_i32_0 : i32, i32
  }
  func.func @transform_2(%arg0: i32) -> (i32, i32) {
    %c0_i32 = arith.constant 0 : i32
    %c0_i32_0 = arith.constant 0 : i32
    %c0_i32_1 = arith.constant 0 : i32
    return %c0_i32, %c0_i32_0 : i32, i32
  }
  func.func @transform_3(%arg0: i32) -> (i32, i32) {
    %c0_i32 = arith.constant 0 : i32
    %c0_i32_0 = arith.constant 0 : i32
    return %arg0, %c0_i32 : i32, i32
  }
}

</mosaic_0001>

<bundles_post_ra>
// kernel: tpu_custom_call.1
= control target key start
LH: loop header
LB: loop body
LE: loop exit
PB: predicated region body
PF: predicated region fallthrough
CT: control target
= control target key end

     0   :  { %9 = vsyncpa [#allocation4], 0  ;;  %s2945_s0 = inlined_call_operand.hbm [shape: f32[8,4096], index: 0, kind: input, shape index: {}]   ;;  %s2946_s1 = inlined_call_operand.hbm [shape: f32[4096,128], index: 1, kind: input, shape index: {}]   ;;  %s2947_s2 = inlined_call_operand.<no memory space> [shape: f32[1,1], index: 2, kind: input, shape index: {}]   ;;  %s2948_s3 = inlined_call_operand.hbm [shape: f32[8,128], index: 3, kind: output, shape index: {}]  }
   0x1   :  { %10 = vsyncpa [#allocation7], 0 }
   0x2   :  { %11 = vsyncpa [#allocation5], 0  ;;  %s2874_s12 = smov [#allocation3]   ;;  %s2875_s14 = smov [#allocation6]  }
   0x3   :  { %s18_s13 = sshll.u32 %s2874_s12, 4  ;;  %s27_s15 = sshll.u32 %s2875_s14, 4  ;;  %s19_s13 = int_to_ptr.vmem [resolvable:$true] %s18_s13  ;;  %s2899_s15 = int_to_ptr.vmem [resolvable:$true] %s27_s15 }
   0x4   :  { %s2802_s18 = scalar_lea.hbm %s2945_s0, 4096 }
   0x5   :  { %p2803_p0 = scmp.ne.s32.totalorder %s2945_s0, %s2802_s18  ;;  %p2806_p1 = scmp.lt.u32.totalorder %s2802_s18, %s2945_s0 }
   0x7   :  { %p2808_p2 = pnand %p2806_p1, %p2803_p0 }
   0x9   :  { %2811 = shalt.err (!%p2808_p2)
}
   0xa   :  { %s2812_s23 = scalar_lea.vmem %s19_s13, 4096  ;;  %p2817_p4 = scmp.lt.s32.totalorder %s19_s13, %s19_s13 }
   0xb   :  { %p2813_p3 = scmp.ne.s32.totalorder %s19_s13, %s2812_s23  ;;  %p2818_p5 = scmp.lt.s32.totalorder %s2812_s23, %s2812_s23 }
   0xd   :  { %p2819_p6 = por %p2818_p5, %p2817_p4 }
   0xf   :  { %p2820_p7 = pnand %p2819_p6, %p2813_p3 }
  0x11   :  { %2823 = shalt.err (!%p2820_p7)
}
  0x12   :  { %21 = dma.hbm_to_vmem [thread:$0]  %s2945_s0, 4096, %s19_s13, [#allocation4]  }
  0x13   :  { %s2824_s28 = scalar_lea.hbm %s2946_s1, 65536 }
  0x14   :  { %p2825_p8 = scmp.ne.s32.totalorder %s2946_s1, %s2824_s28  ;;  %p2828_p9 = scmp.lt.u32.totalorder %s2824_s28, %s2946_s1 }
  0x16   :  { %p2830_p10 = pnand %p2828_p9, %p2825_p8 }
  0x18   :  { %2833 = shalt.err (!%p2830_p10)
}
  0x19   :  { %s2834_s6 = scalar_lea.vmem %s2899_s15, 65536  ;;  %p2839_p12 = scmp.lt.s32.totalorder %s2899_s15, %s2899_s15 }
  0x1a   :  { %p2835_p11 = scmp.ne.s32.totalorder %s2899_s15, %s2834_s6  ;;  %p2840_p13 = scmp.lt.s32.totalorder %s2834_s6, %s2834_s6 }
  0x1c   :  { %p2841_p0 = por %p2840_p13, %p2839_p12 }
  0x1e   :  { %p2842_p1 = pnand %p2841_p0, %p2835_p11 }
  0x20   :  { %2845 = shalt.err (!%p2842_p1)
}
  0x21   :  { %s2876_s0 = smov 128   ;;  %s2877_s7 = smov 8  }
  0x22   :  { %33 = dma.hbm_to_vmem [thread:$0]  %s2946_s1, 65536, %s2899_s15, [#allocation7], %s2876_s0, %s2876_s0, %s2877_s7  }
  0x23   :  { %2868 = dma.done.wait [#allocation4], 4096  }
  0x24   :  { %2869 = vsyncadd [#allocation4], 4294963200 }
  0x25   :  { %2870 = dma.done.wait [#allocation7], 65536  }
  0x26   :  { %2871 = vsyncadd [#allocation7], 4294901760  ;;  %v90_v0 = vld [vmem:[#allocation6 + $0x80] sm:$0xff]  ;;  %v91_v1 = vld [vmem:[#allocation6 + $0x88] sm:$0xff] }
  0x27   :  { %v74_v2 = vld [vmem:[#allocation6] sm:$0xff]  ;;  %v2285_v3 = vpack.c.bf16 %v91_v1, %v90_v0  ;;  %v75_v4 = vld [vmem:[#allocation6 + $0x8] sm:$0xff]  ;;  %v92_v11 = vld [vmem:[#allocation6 + $0x90] sm:$0xff] }
  0x28   :  { %v122_v5 = vld [vmem:[#allocation6 + $0x180] sm:$0xff]  ;;  %v123_v6 = vld [vmem:[#allocation6 + $0x188] sm:$0xff]  ;;  %v2287_v7 = vpack.c.bf16 %v75_v4, %v74_v2  ;;  %v93_v13 = vld [vmem:[#allocation6 + $0x98] sm:$0xff] }
  0x29   :  { %v2317_v8 = vpack.c.bf16 %v123_v6, %v122_v5  ;;  %v106_v9 = vld [vmem:[#allocation6 + $0x100] sm:$0xff]  ;;  %v107_v10 = vld [vmem:[#allocation6 + $0x108] sm:$0xff]  ;;  %2286 = vmatprep.subr.bf16.mxu0 %v2285_v3  ;;  %v76_v14 = vld [vmem:[#allocation6 + $0x10] sm:$0xff]  ;;  %v2289_v16 = vpack.c.bf16 %v93_v13, %v92_v11 }
  0x2a   :  { %v2319_v12 = vpack.c.bf16 %v107_v10, %v106_v9  ;;  %v77_v15 = vld [vmem:[#allocation6 + $0x18] sm:$0xff]  ;;  %2288 = vmatpush3.bf16.msra.mxu0 %v2287_v7  ;;  %v124_v18 = vld [vmem:[#allocation6 + $0x190] sm:$0xff]  ;;  %v94_v23 = vld [vmem:[#allocation6 + $0xa0] sm:$0xff] }
  0x2b   :  { %2318 = vmatprep.subr.bf16.mxu1 %v2317_v8  ;;  %v2291_v17 = vpack.c.bf16 %v77_v15, %v76_v14  ;;  %v125_v19 = vld [vmem:[#allocation6 + $0x198] sm:$0xff]  ;;  %v108_v20 = vld [vmem:[#allocation6 + $0x110] sm:$0xff]  ;;  %v95_v24 = vld [vmem:[#allocation6 + $0xa8] sm:$0xff]  ;;  %2290 = vmatprep.subr.bf16.mxu0 %v2289_v16 }
  0x2c   :  { %2320 = vmatpush3.bf16.msra.mxu1 %v2319_v12  ;;  %v2321_v21 = vpack.c.bf16 %v125_v19, %v124_v18  ;;  %v109_v22 = vld [vmem:[#allocation6 + $0x118] sm:$0xff]  ;;  %v2293_v26 = vpack.c.bf16 %v95_v24, %v94_v23  ;;  %v78_v27 = vld [vmem:[#allocation6 + $0x20] sm:$0xff]  ;;  %v79_v28 = vld [vmem:[#allocation6 + $0x28] sm:$0xff] }
  0x2d   :  { %v2323_v25 = vpack.c.bf16 %v109_v22, %v108_v20  ;;  %v126_v29 = vld [vmem:[#allocation6 + $0x1a0] sm:$0xff]  ;;  %v127_v30 = vld [vmem:[#allocation6 + $0x1a8] sm:$0xff]  ;;  %v2295_v33 = vpack.c.bf16 %v79_v28, %v78_v27  ;;  %v96_v35 = vld [vmem:[#allocation6 + $0xb0] sm:$0xff] }
  0x2e   :  { %2322 = vmatprep.subr.bf16.mxu1 %v2321_v21  ;;  %v110_v31 = vld [vmem:[#allocation6 + $0x120] sm:$0xff]  ;;  %v111_v32 = vld [vmem:[#allocation6 + $0x128] sm:$0xff]  ;;  %2292 = vmatpush3.bf16.msra.mxu0 %v2291_v17  ;;  %v2325_v34 = vpack.c.bf16 %v127_v30, %v126_v29  ;;  %v97_v36 = vld [vmem:[#allocation6 + $0xb8] sm:$0xff] }
  0x2f   :  { %v80_v37 = vld [vmem:[#allocation6 + $0x30] sm:$0xff]  ;;  %2294 = vmatprep.subr.bf16.mxu0 %v2293_v26  ;;  %v2327_v38 = vpack.c.bf16 %v111_v32, %v110_v31  ;;  %v2297_v39 = vpack.c.bf16 %v97_v36, %v96_v35  ;;  %v81_v40 = vld [vmem:[#allocation6 + $0x38] sm:$0xff]  ;;  %v98_v46 = vld [vmem:[#allocation6 + $0xc0] sm:$0xff] }
  0x30   :  { %2324 = vmatpush3.bf16.msra.mxu1 %v2323_v25  ;;  %v128_v41 = vld [vmem:[#allocation6 + $0x1b0] sm:$0xff]  ;;  %v129_v42 = vld [vmem:[#allocation6 + $0x1b8] sm:$0xff]  ;;  %v99_v47 = vld [vmem:[#allocation6 + $0xc8] sm:$0xff]  ;;  %v2299_v48 = vpack.c.bf16 %v81_v40, %v80_v37 }
  0x31   :  { %2326 = vmatprep.subr.bf16.mxu1 %v2325_v34  ;;  %v2329_v43 = vpack.c.bf16 %v129_v42, %v128_v41  ;;  %v112_v44 = vld [vmem:[#allocation6 + $0x130] sm:$0xff]  ;;  %v113_v45 = vld [vmem:[#allocation6 + $0x138] sm:$0xff]  ;;  %v130_v49 = vld [vmem:[#allocation6 + $0x1c0] sm:$0xff]  ;;  %v2301_v52 = vpack.c.bf16 %v99_v47, %v98_v46 }
  0x32   :  { %2296 = vmatpush3.bf16.msra.mxu0 %v2295_v33  ;;  %v131_v50 = vld [vmem:[#allocation6 + $0x1c8] sm:$0xff]  ;;  %v2331_v51 = vpack.c.bf16 %v113_v45, %v112_v44  ;;  %v82_v53 = vld [vmem:[#allocation6 + $0x40] sm:$0xff]  ;;  %v100_v58 = vld [vmem:[#allocation6 + $0xd0] sm:$0xff] }
  0x33   :  { %2298 = vmatprep.subr.bf16.mxu0 %v2297_v39  ;;  %v83_v54 = vld [vmem:[#allocation6 + $0x48] sm:$0xff]  ;;  %v114_v55 = vld [vmem:[#allocation6 + $0x140] sm:$0xff]  ;;  %v2333_v56 = vpack.c.bf16 %v131_v50, %v130_v49  ;;  %v101_v59 = vld [vmem:[#allocation6 + $0xd8] sm:$0xff] }
  0x34   :  { %2328 = vmatpush3.bf16.msra.mxu1 %v2327_v38  ;;  %v115_v57 = vld [vmem:[#allocation6 + $0x148] sm:$0xff]  ;;  %v132_v60 = vld [vmem:[#allocation6 + $0x1d0] sm:$0xff]  ;;  %v133_v61 = vld [vmem:[#allocation6 + $0x1d8] sm:$0xff]  ;;  %v2303_v62 = vpack.c.bf16 %v83_v54, %v82_v53  ;;  %v2305_v0 = vpack.c.bf16 %v101_v59, %v100_v58 }
  0x35   :  { %2330 = vmatprep.subr.bf16.mxu1 %v2329_v43  ;;  %v2335_v63 = vpack.c.bf16 %v115_v57, %v114_v55  ;;  %v84_v1 = vld [vmem:[#allocation6 + $0x50] sm:$0xff]  ;;  %v85_v2 = vld [vmem:[#allocation6 + $0x58] sm:$0xff]  ;;  %v2337_v4 = vpack.c.bf16 %v133_v61, %v132_v60  ;;  %v102_v6 = vld [vmem:[#allocation6 + $0xe0] sm:$0xff] }
  0x36   :  { %2300 = vmatpush3.bf16.msra.mxu0 %v2299_v48  ;;  %v116_v3 = vld [vmem:[#allocation6 + $0x150] sm:$0xff]  ;;  %v117_v5 = vld [vmem:[#allocation6 + $0x158] sm:$0xff]  ;;  %v103_v7 = vld [vmem:[#allocation6 + $0xe8] sm:$0xff]  ;;  %v2307_v10 = vpack.c.bf16 %v85_v2, %v84_v1 }
  0x37   :  { %2302 = vmatprep.subr.bf16.mxu0 %v2301_v52  ;;  %v134_v8 = vld [vmem:[#allocation6 + $0x1e0] sm:$0xff]  ;;  %v135_v9 = vld [vmem:[#allocation6 + $0x1e8] sm:$0xff]  ;;  %v2339_v13 = vpack.c.bf16 %v117_v5, %v116_v3  ;;  %v2309_v14 = vpack.c.bf16 %v103_v7, %v102_v6  ;;  %v104_v19 = vld [vmem:[#allocation6 + $0xf0] sm:$0xff] }
  0x38   :  { %2332 = vmatpush3.bf16.msra.mxu1 %v2331_v51  ;;  %v86_v11 = vld [vmem:[#allocation6 + $0x60] sm:$0xff]  ;;  %v87_v12 = vld [vmem:[#allocation6 + $0x68] sm:$0xff]  ;;  %v2341_v18 = vpack.c.bf16 %v135_v9, %v134_v8  ;;  %v105_v20 = vld [vmem:[#allocation6 + $0xf8] sm:$0xff] }
  0x39   :  { %2334 = vmatprep.subr.bf16.mxu1 %v2333_v56  ;;  %v118_v15 = vld [vmem:[#allocation6 + $0x160] sm:$0xff]  ;;  %v119_v16 = vld [vmem:[#allocation6 + $0x168] sm:$0xff]  ;;  %v45_v21 = vld [vmem:[#allocation3 + $0x18] sm:$0xff]  ;;  %v2311_v24 = vpack.c.bf16 %v87_v12, %v86_v11  ;;  %v2313_v26 = vpack.c.bf16 %v105_v20, %v104_v19 }
  0x3a   :  { %2304 = vmatpush3.bf16.msra.mxu0 %v2303_v62  ;;  %v43_v17 = vld [vmem:[#allocation3 + $0x8] sm:$0xff]  ;;  %v136_v22 = vld [vmem:[#allocation6 + $0x1f0] sm:$0xff]  ;;  %v137_v23 = vld [vmem:[#allocation6 + $0x1f8] sm:$0xff]  ;;  %722 = vmatprep.mubr.f32.mxu1 %v45_v21  ;;  %v2343_v25 = vpack.c.bf16 %v119_v16, %v118_v15 }
  0x3b   :  { %2306 = vmatprep.subr.bf16.mxu0 %v2305_v0  ;;  %652 = vmatprep.mubr.f32.mxu0 %v43_v17  ;;  %v88_v27 = vld [vmem:[#allocation6 + $0x70] sm:$0xff]  ;;  %v89_v28 = vld [vmem:[#allocation6 + $0x78] sm:$0xff]  ;;  %v2345_v30 = vpack.c.bf16 %v137_v23, %v136_v22  ;;  %v154_v32 = vld [vmem:[#allocation6 + $0x280] sm:$0xff] }
  0x3c   :  { %2336 = vmatpush3.bf16.msra.mxu1 %v2335_v63  ;;  %v120_v29 = vld [vmem:[#allocation6 + $0x170] sm:$0xff]  ;;  %v121_v31 = vld [vmem:[#allocation6 + $0x178] sm:$0xff]  ;;  %v155_v33 = vld [vmem:[#allocation6 + $0x288] sm:$0xff]  ;;  %v2315_v36 = vpack.c.bf16 %v89_v28, %v88_v27 }
  0x3d   :  { %2338 = vmatprep.subr.bf16.mxu1 %v2337_v4  ;;  %v186_v34 = vld [vmem:[#allocation6 + $0x380] sm:$0xff]  ;;  %v187_v35 = vld [vmem:[#allocation6 + $0x388] sm:$0xff]  ;;  %v2347_v37 = vpack.c.bf16 %v121_v31, %v120_v29  ;;  %v2349_v38 = vpack.c.bf16 %v155_v33, %v154_v32  ;;  %v156_v44 = vld [vmem:[#allocation6 + $0x290] sm:$0xff] }
  0x3e   :  { %2308 = vmatpush3.bf16.msra.mxu0 %v2307_v10  ;;  %v138_v39 = vld [vmem:[#allocation6 + $0x200] sm:$0xff]  ;;  %v139_v40 = vld [vmem:[#allocation6 + $0x208] sm:$0xff]  ;;  %v2381_v42 = vpack.c.bf16 %v187_v35, %v186_v34  ;;  %v157_v45 = vld [vmem:[#allocation6 + $0x298] sm:$0xff] }
  0x3f   :  { %2310 = vmatprep.subr.bf16.mxu0 %v2309_v14  ;;  %v170_v41 = vld [vmem:[#allocation6 + $0x300] sm:$0xff]  ;;  %v171_v43 = vld [vmem:[#allocation6 + $0x308] sm:$0xff]  ;;  %v188_v46 = vld [vmem:[#allocation6 + $0x390] sm:$0xff]  ;;  %v2351_v49 = vpack.c.bf16 %v139_v40, %v138_v39  ;;  %v2353_v52 = vpack.c.bf16 %v157_v45, %v156_v44 }
  0x40   :  { %2340 = vmatpush3.bf16.msra.mxu1 %v2339_v13  ;;  %v189_v47 = vld [vmem:[#allocation6 + $0x398] sm:$0xff]  ;;  %v42_v48 = vld [vmem:[#allocation3] sm:$0xff]  ;;  %v44_v50 = vld [vmem:[#allocation3 + $0x10] sm:$0xff]  ;;  %v2383_v51 = vpack.c.bf16 %v171_v43, %v170_v41 }
  0x41   :  { %2342 = vmatprep.subr.bf16.mxu1 %v2341_v18  ;;  %v140_v53 = vld [vmem:[#allocation6 + $0x210] sm:$0xff]  ;;  %v141_v54 = vld [vmem:[#allocation6 + $0x218] sm:$0xff]  ;;  %v2385_v56 = vpack.c.bf16 %v189_v47, %v188_v46  ;;  %v158_v58 = vld [vmem:[#allocation6 + $0x2a0] sm:$0xff] }
  0x42   :  { %2312 = vmatpush3.bf16.msra.mxu0 %v2311_v24  ;;  %v172_v55 = vld [vmem:[#allocation6 + $0x310] sm:$0xff]  ;;  %v173_v57 = vld [vmem:[#allocation6 + $0x318] sm:$0xff]  ;;  %v159_v59 = vld [vmem:[#allocation6 + $0x2a8] sm:$0xff]  ;;  %v2355_v62 = vpack.c.bf16 %v141_v54, %v140_v53 }
  0x43   :  { %2314 = vmatprep.subr.bf16.mxu0 %v2313_v26  ;;  %v190_v60 = vld [vmem:[#allocation6 + $0x3a0] sm:$0xff]  ;;  %v191_v61 = vld [vmem:[#allocation6 + $0x3a8] sm:$0xff]  ;;  %v2387_v63 = vpack.c.bf16 %v173_v57, %v172_v55  ;;  %v2357_v0 = vpack.c.bf16 %v159_v59, %v158_v58  ;;  %v160_v6 = vld [vmem:[#allocation6 + $0x2b0] sm:$0xff] }
  0x44   :  { %2344 = vmatpush3.bf16.msra.mxu1 %v2343_v25  ;;  %v142_v1 = vld [vmem:[#allocation6 + $0x220] sm:$0xff]  ;;  %v143_v2 = vld [vmem:[#allocation6 + $0x228] sm:$0xff]  ;;  %v2389_v4 = vpack.c.bf16 %v191_v61, %v190_v60  ;;  %v161_v7 = vld [vmem:[#allocation6 + $0x2b8] sm:$0xff] }
  0x45   :  { %2346 = vmatprep.subr.bf16.mxu1 %v2345_v30  ;;  %v174_v3 = vld [vmem:[#allocation6 + $0x320] sm:$0xff]  ;;  %v175_v5 = vld [vmem:[#allocation6 + $0x328] sm:$0xff]  ;;  %v192_v8 = vld [vmem:[#allocation6 + $0x3b0] sm:$0xff]  ;;  %v2359_v10 = vpack.c.bf16 %v143_v2, %v142_v1  ;;  %v2361_v12 = vpack.c.bf16 %v161_v7, %v160_v6 }
  0x46   :  { %2316 = vmatpush3.bf16.msra.mxu0 %v2315_v36  ;;  %v193_v9 = vld [vmem:[#allocation6 + $0x3b8] sm:$0xff]  ;;  %v2391_v11 = vpack.c.bf16 %v175_v5, %v174_v3  ;;  %v144_v13 = vld [vmem:[#allocation6 + $0x230] sm:$0xff]  ;;  %v162_v18 = vld [vmem:[#allocation6 + $0x2c0] sm:$0xff] }
  0x47   :  { %2350 = vmatprep.subr.bf16.mxu0 %v2349_v38  ;;  %v145_v14 = vld [vmem:[#allocation6 + $0x238] sm:$0xff]  ;;  %v176_v15 = vld [vmem:[#allocation6 + $0x330] sm:$0xff]  ;;  %v2393_v16 = vpack.c.bf16 %v193_v9, %v192_v8  ;;  %v163_v19 = vld [vmem:[#allocation6 + $0x2c8] sm:$0xff] }
  0x48   :  { %2348 = vmatpush3.bf16.msra.mxu1 %v2347_v37  ;;  %v177_v17 = vld [vmem:[#allocation6 + $0x338] sm:$0xff]  ;;  %v194_v20 = vld [vmem:[#allocation6 + $0x3c0] sm:$0xff]  ;;  %v195_v21 = vld [vmem:[#allocation6 + $0x3c8] sm:$0xff]  ;;  %v2363_v22 = vpack.c.bf16 %v145_v14, %v144_v13  ;;  %v2365_v26 = vpack.c.bf16 %v163_v19, %v162_v18 }
  0x49   :  { %2382 = vmatprep.subr.bf16.mxu1 %v2381_v42  ;;  %653 = vmatmul.mubr.f32.vlgmr.msra.gmra.mrb[0].mxu0 %v42_v48  ;;  %v146_v23 = vld [vmem:[#allocation6 + $0x240] sm:$0xff]  ;;  %v47_v24 = vld [vmem:[#allocation3 + $0x28] sm:$0xff]  ;;  %v2395_v25 = vpack.c.bf16 %v177_v17, %v176_v15  ;;  %v49_v29 = vld [vmem:[#allocation3 + $0x38] sm:$0xff]  ;;  %v2397_v30 = vpack.c.bf16 %v195_v21, %v194_v20 }
  0x4a   :  { %2352 = vmatpush3.bf16.msra.mxu0 %v2351_v49  ;;  %v147_v27 = vld [vmem:[#allocation6 + $0x248] sm:$0xff]  ;;  %v178_v28 = vld [vmem:[#allocation6 + $0x340] sm:$0xff]  ;;  %v164_v32 = vld [vmem:[#allocation6 + $0x2d0] sm:$0xff]  ;;  %792 = vmatprep.mubr.f32.mxu0 %v47_v24 }
  0x4b   :  { %723 = vmatmul.mubr.f32.vlgmr.msra.gmra.mrb[0].mxu1 %v44_v50  ;;  %2354 = vmatprep.subr.bf16.mxu0 %v2353_v52  ;;  %v179_v31 = vld [vmem:[#allocation6 + $0x348] sm:$0xff]  ;;  %v165_v33 = vld [vmem:[#allocation6 + $0x2d8] sm:$0xff]  ;;  %v196_v34 = vld [vmem:[#allocation6 + $0x3d0] sm:$0xff]  ;;  %v2367_v36 = vpack.c.bf16 %v147_v27, %v146_v23 }
  0x4c   :  { %2384 = vmatpush3.bf16.msra.mxu1 %v2383_v51  ;;  %v197_v35 = vld [vmem:[#allocation6 + $0x3d8] sm:$0xff]  ;;  %862 = vmatprep.mubr.f32.mxu1 %v49_v29  ;;  %v2399_v37 = vpack.c.bf16 %v179_v31, %v178_v28  ;;  %v2369_v38 = vpack.c.bf16 %v165_v33, %v164_v32  ;;  %v148_v39 = vld [vmem:[#allocation6 + $0x250] sm:$0xff]  ;;  %v166_v44 = vld [vmem:[#allocation6 + $0x2e0] sm:$0xff] }
  0x4d   :  { %2386 = vmatprep.subr.bf16.mxu1 %v2385_v56  ;;  %v149_v40 = vld [vmem:[#allocation6 + $0x258] sm:$0xff]  ;;  %v180_v41 = vld [vmem:[#allocation6 + $0x350] sm:$0xff]  ;;  %v2401_v42 = vpack.c.bf16 %v197_v35, %v196_v34  ;;  %v167_v45 = vld [vmem:[#allocation6 + $0x2e8] sm:$0xff] }
  0x4e   :  { %2356 = vmatpush3.bf16.msra.mxu0 %v2355_v62  ;;  %v181_v43 = vld [vmem:[#allocation6 + $0x358] sm:$0xff]  ;;  %v198_v46 = vld [vmem:[#allocation6 + $0x3e0] sm:$0xff]  ;;  %v199_v47 = vld [vmem:[#allocation6 + $0x3e8] sm:$0xff]  ;;  %v2371_v48 = vpack.c.bf16 %v149_v40, %v148_v39  ;;  %v2373_v50 = vpack.c.bf16 %v167_v45, %v166_v44 }
  0x4f   :  { %2358 = vmatprep.subr.bf16.mxu0 %v2357_v0  ;;  %v2403_v49 = vpack.c.bf16 %v181_v43, %v180_v41  ;;  %v150_v51 = vld [vmem:[#allocation6 + $0x260] sm:$0xff]  ;;  %v151_v52 = vld [vmem:[#allocation6 + $0x268] sm:$0xff]  ;;  %v2405_v54 = vpack.c.bf16 %v199_v47, %v198_v46  ;;  %v168_v56 = vld [vmem:[#allocation6 + $0x2f0] sm:$0xff] }
  0x50   :  { %2388 = vmatpush3.bf16.msra.mxu1 %v2387_v63  ;;  %v182_v53 = vld [vmem:[#allocation6 + $0x360] sm:$0xff]  ;;  %v183_v55 = vld [vmem:[#allocation6 + $0x368] sm:$0xff]  ;;  %v169_v57 = vld [vmem:[#allocation6 + $0x2f8] sm:$0xff]  ;;  %v2375_v60 = vpack.c.bf16 %v151_v52, %v150_v51 }
  0x51   :  { %2390 = vmatprep.subr.bf16.mxu1 %v2389_v4  ;;  %v200_v58 = vld [vmem:[#allocation6 + $0x3f0] sm:$0xff]  ;;  %v201_v59 = vld [vmem:[#allocation6 + $0x3f8] sm:$0xff]  ;;  %v2407_v61 = vpack.c.bf16 %v183_v55, %v182_v53  ;;  %v2377_v62 = vpack.c.bf16 %v169_v57, %v168_v56  ;;  %v218_v4 = vld [vmem:[#allocation6 + $0x480] sm:$0xff] }
  0x52   :  { %2360 = vmatpush3.bf16.msra.mxu0 %v2359_v10  ;;  %v152_v63 = vld [vmem:[#allocation6 + $0x270] sm:$0xff]  ;;  %v153_v0 = vld [vmem:[#allocation6 + $0x278] sm:$0xff]  ;;  %v2409_v2 = vpack.c.bf16 %v201_v59, %v200_v58  ;;  %v219_v5 = vld [vmem:[#allocation6 + $0x488] sm:$0xff] }
  0x53   :  { %2362 = vmatprep.subr.bf16.mxu0 %v2361_v12  ;;  %v184_v1 = vld [vmem:[#allocation6 + $0x370] sm:$0xff]  ;;  %v185_v3 = vld [vmem:[#allocation6 + $0x378] sm:$0xff]  ;;  %v250_v6 = vld [vmem:[#allocation6 + $0x580] sm:$0xff]  ;;  %v2379_v8 = vpack.c.bf16 %v153_v0, %v152_v63  ;;  %v2413_v10 = vpack.c.bf16 %v219_v5, %v218_v4 }
  0x54   :  { %2392 = vmatpush3.bf16.msra.mxu1 %v2391_v11  ;;  %v251_v7 = vld [vmem:[#allocation6 + $0x588] sm:$0xff]  ;;  %v2411_v9 = vpack.c.bf16 %v185_v3, %v184_v1  ;;  %v202_v11 = vld [vmem:[#allocation6 + $0x400] sm:$0xff]  ;;  %v221_v17 = vld [vmem:[#allocation6 + $0x498] sm:$0xff] }
  0x55   :  { %2394 = vmatprep.subr.bf16.mxu1 %v2393_v16  ;;  %v203_v12 = vld [vmem:[#allocation6 + $0x408] sm:$0xff]  ;;  %v234_v13 = vld [vmem:[#allocation6 + $0x500] sm:$0xff]  ;;  %v2445_v14 = vpack.c.bf16 %v251_v7, %v250_v6  ;;  %v220_v16 = vld [vmem:[#allocation6 + $0x490] sm:$0xff] }
  0x56   :  { %2364 = vmatpush3.bf16.msra.mxu0 %v2363_v22  ;;  %v235_v15 = vld [vmem:[#allocation6 + $0x508] sm:$0xff]  ;;  %v252_v18 = vld [vmem:[#allocation6 + $0x590] sm:$0xff]  ;;  %v253_v19 = vld [vmem:[#allocation6 + $0x598] sm:$0xff]  ;;  %v2415_v21 = vpack.c.bf16 %v203_v12, %v202_v11  ;;  %v2417_v24 = vpack.c.bf16 %v221_v17, %v220_v16 }
  0x57   :  { %2366 = vmatprep.subr.bf16.mxu0 %v2365_v26  ;;  %v46_v20 = vld [vmem:[#allocation3 + $0x20] sm:$0xff]  ;;  %v48_v22 = vld [vmem:[#allocation3 + $0x30] sm:$0xff]  ;;  %v2447_v23 = vpack.c.bf16 %v235_v15, %v234_v13  ;;  %v205_v26 = vld [vmem:[#allocation6 + $0x418] sm:$0xff]  ;;  %v2449_v28 = vpack.c.bf16 %v253_v19, %v252_v18 }
  0x58   :  { %2396 = vmatpush3.bf16.msra.mxu1 %v2395_v25  ;;  %v204_v25 = vld [vmem:[#allocation6 + $0x410] sm:$0xff]  ;;  %v237_v29 = vld [vmem:[#allocation6 + $0x518] sm:$0xff]  ;;  %v223_v31 = vld [vmem:[#allocation6 + $0x4a8] sm:$0xff] }
  0x59   :  { %2398 = vmatprep.subr.bf16.mxu1 %v2397_v30  ;;  %v236_v27 = vld [vmem:[#allocation6 + $0x510] sm:$0xff]  ;;  %v222_v30 = vld [vmem:[#allocation6 + $0x4a0] sm:$0xff]  ;;  %v255_v33 = vld [vmem:[#allocation6 + $0x5a8] sm:$0xff]  ;;  %v2419_v35 = vpack.c.bf16 %v205_v26, %v204_v25 }
  0x5a   :  { %2368 = vmatpush3.bf16.msra.mxu0 %v2367_v36  ;;  %v254_v32 = vld [vmem:[#allocation6 + $0x5a0] sm:$0xff]  ;;  %v51_v34 = vld [vmem:[#allocation3 + $0x48] sm:$0xff]  ;;  %v53_v36 = vld [vmem:[#allocation3 + $0x58] sm:$0xff] }
  0x5b   :  { %2370 = vmatprep.subr.bf16.mxu0 %v2369_v38  ;;  %v2421_v38 = vpack.c.bf16 %v223_v31, %v222_v30  ;;  %v206_v39 = vld [vmem:[#allocation6 + $0x420] sm:$0xff]  ;;  %v207_v40 = vld [vmem:[#allocation6 + $0x428] sm:$0xff]  ;;  %v224_v44 = vld [vmem:[#allocation6 + $0x4b0] sm:$0xff] }
  0x5c   :  { %2400 = vmatpush3.bf16.msra.mxu1 %v2399_v37  ;;  %v2451_v37 = vpack.c.bf16 %v237_v29, %v236_v27  ;;  %v238_v41 = vld [vmem:[#allocation6 + $0x520] sm:$0xff]  ;;  %v239_v43 = vld [vmem:[#allocation6 + $0x528] sm:$0xff]  ;;  %v225_v45 = vld [vmem:[#allocation6 + $0x4b8] sm:$0xff] }
  0x5d   :  { %2402 = vmatprep.subr.bf16.mxu1 %v2401_v42  ;;  %v2453_v42 = vpack.c.bf16 %v255_v33, %v254_v32  ;;  %v256_v46 = vld [vmem:[#allocation6 + $0x5b0] sm:$0xff]  ;;  %v257_v47 = vld [vmem:[#allocation6 + $0x5b8] sm:$0xff]  ;;  %v226_v56 = vld [vmem:[#allocation6 + $0x4c0] sm:$0xff] }
  0x5e   :  { %2372 = vmatpush3.bf16.msra.mxu0 %v2371_v48  ;;  %v2423_v48 = vpack.c.bf16 %v207_v40, %v206_v39  ;;  %v208_v51 = vld [vmem:[#allocation6 + $0x430] sm:$0xff]  ;;  %v209_v52 = vld [vmem:[#allocation6 + $0x438] sm:$0xff]  ;;  %v227_v57 = vld [vmem:[#allocation6 + $0x4c8] sm:$0xff] }
  0x5f   :  { %2374 = vmatprep.subr.bf16.mxu0 %v2373_v50  ;;  %v2425_v50 = vpack.c.bf16 %v225_v45, %v224_v44  ;;  %v240_v53 = vld [vmem:[#allocation6 + $0x530] sm:$0xff]  ;;  %v241_v55 = vld [vmem:[#allocation6 + $0x538] sm:$0xff]  ;;  %v258_v58 = vld [vmem:[#allocation6 + $0x5c0] sm:$0xff] }
  0x60   :  { %2404 = vmatpush3.bf16.msra.mxu1 %v2403_v49  ;;  %v2455_v49 = vpack.c.bf16 %v239_v43, %v238_v41  ;;  %v259_v59 = vld [vmem:[#allocation6 + $0x5c8] sm:$0xff]  ;;  %v210_v63 = vld [vmem:[#allocation6 + $0x440] sm:$0xff]  ;;  %v228_v4 = vld [vmem:[#allocation6 + $0x4d0] sm:$0xff] }
  0x61   :  { %2406 = vmatprep.subr.bf16.mxu1 %v2405_v54  ;;  %v2457_v54 = vpack.c.bf16 %v257_v47, %v256_v46  ;;  %v211_v0 = vld [vmem:[#allocation6 + $0x448] sm:$0xff]  ;;  %v242_v1 = vld [vmem:[#allocation6 + $0x540] sm:$0xff]  ;;  %v229_v5 = vld [vmem:[#allocation6 + $0x4d8] sm:$0xff] }
  0x62   :  { %2376 = vmatpush3.bf16.msra.mxu0 %v2375_v60  ;;  %v2427_v60 = vpack.c.bf16 %v209_v52, %v208_v51  ;;  %v243_v3 = vld [vmem:[#allocation6 + $0x548] sm:$0xff]  ;;  %v260_v6 = vld [vmem:[#allocation6 + $0x5d0] sm:$0xff]  ;;  %v261_v7 = vld [vmem:[#allocation6 + $0x5d8] sm:$0xff] }
  0x63   :  { %2378 = vmatprep.subr.bf16.mxu0 %v2377_v62  ;;  %v2429_v62 = vpack.c.bf16 %v227_v57, %v226_v56  ;;  %v212_v11 = vld [vmem:[#allocation6 + $0x450] sm:$0xff]  ;;  %v213_v12 = vld [vmem:[#allocation6 + $0x458] sm:$0xff]  ;;  %v230_v16 = vld [vmem:[#allocation6 + $0x4e0] sm:$0xff] }
  0x64   :  { %2408 = vmatpush3.bf16.msra.mxu1 %v2407_v61  ;;  %v2459_v61 = vpack.c.bf16 %v241_v55, %v240_v53  ;;  %v244_v13 = vld [vmem:[#allocation6 + $0x550] sm:$0xff]  ;;  %v245_v15 = vld [vmem:[#allocation6 + $0x558] sm:$0xff]  ;;  %v231_v17 = vld [vmem:[#allocation6 + $0x4e8] sm:$0xff] }
  0x65   :  { %2410 = vmatprep.subr.bf16.mxu1 %v2409_v2  ;;  %v2461_v2 = vpack.c.bf16 %v259_v59, %v258_v58  ;;  %v262_v18 = vld [vmem:[#allocation6 + $0x5e0] sm:$0xff]  ;;  %v263_v19 = vld [vmem:[#allocation6 + $0x5e8] sm:$0xff]  ;;  %v233_v29 = vld [vmem:[#allocation6 + $0x4f8] sm:$0xff] }
  0x66   :  { %2380 = vmatpush3.bf16.msra.mxu0 %v2379_v8  ;;  %v2431_v8 = vpack.c.bf16 %v211_v0, %v210_v63  ;;  %v246_v25 = vld [vmem:[#allocation6 + $0x560] sm:$0xff]  ;;  %v2469_v26 = vpack.c.bf16 %v263_v19, %v262_v18  ;;  %v247_v27 = vld [vmem:[#allocation6 + $0x568] sm:$0xff]  ;;  %v264_v30 = vld [vmem:[#allocation6 + $0x5f0] sm:$0xff] }
  0x67   :  { %2414 = vmatprep.subr.bf16.mxu0 %v2413_v10  ;;  %v2433_v10 = vpack.c.bf16 %v229_v5, %v228_v4  ;;  %v265_v31 = vld [vmem:[#allocation6 + $0x5f8] sm:$0xff]  ;;  %v2471_v33 = vpack.c.bf16 %v247_v27, %v246_v25  ;;  %v282_v40 = vld [vmem:[#allocation6 + $0x680] sm:$0xff]  ;;  %v283_v41 = vld [vmem:[#allocation6 + $0x688] sm:$0xff] }
  0x68   :  { %2412 = vmatpush3.bf16.msra.mxu1 %v2411_v9  ;;  %v2463_v9 = vpack.c.bf16 %v243_v3, %v242_v1  ;;  %v249_v39 = vld [vmem:[#allocation6 + $0x578] sm:$0xff]  ;;  %v315_v43 = vld [vmem:[#allocation6 + $0x788] sm:$0xff]  ;;  %v2477_v46 = vpack.c.bf16 %v283_v41, %v282_v40  ;;  %v266_v47 = vld [vmem:[#allocation6 + $0x600] sm:$0xff] }
  0x69   :  { %2446 = vmatprep.subr.bf16.mxu1 %v2445_v14  ;;  %793 = vmatmul.mubr.f32.vlgmr.msra.gmra.mrb[2].mxu0 %v46_v20  ;;  %v2465_v14 = vpack.c.bf16 %v261_v7, %v260_v6  ;;  %v2435_v20 = vpack.c.bf16 %v213_v12, %v212_v11  ;;  %v299_v51 = vld [vmem:[#allocation6 + $0x708] sm:$0xff]  ;;  %v284_v52 = vld [vmem:[#allocation6 + $0x690] sm:$0xff]  ;;  %v285_v53 = vld [vmem:[#allocation6 + $0x698] sm:$0xff] }
  0x6a   :  { %2416 = vmatpush3.bf16.msra.mxu0 %v2415_v21  ;;  %932 = vmatprep.mubr.f32.mxu0 %v51_v34  ;;  %v2467_v21 = vpack.c.bf16 %v245_v15, %v244_v13  ;;  %v317_v55 = vld [vmem:[#allocation6 + $0x798] sm:$0xff]  ;;  %v50_v56 = vld [vmem:[#allocation3 + $0x40] sm:$0xff]  ;;  %v52_v58 = vld [vmem:[#allocation3 + $0x50] sm:$0xff] }
  0x6b   :  { %863 = vmatmul.mubr.f32.vlgmr.msra.gmra.mrb[2].mxu1 %v48_v22  ;;  %2418 = vmatprep.subr.bf16.mxu0 %v2417_v24  ;;  %v2437_v22 = vpack.c.bf16 %v231_v17, %v230_v16  ;;  %v215_v24 = vld [vmem:[#allocation6 + $0x468] sm:$0xff]  ;;  %v300_v63 = vld [vmem:[#allocation6 + $0x710] sm:$0xff]  ;;  %v301_v1 = vld [vmem:[#allocation6 + $0x718] sm:$0xff] }
  0x6c   :  { %2448 = vmatpush3.bf16.msra.mxu1 %v2447_v23  ;;  %1002 = vmatprep.mubr.f32.mxu1 %v53_v36  ;;  %v214_v23 = vld [vmem:[#allocation6 + $0x460] sm:$0xff]  ;;  %v217_v36 = vld [vmem:[#allocation6 + $0x478] sm:$0xff]  ;;  %v287_v3 = vld [vmem:[#allocation6 + $0x6a8] sm:$0xff] }
  0x6d   :  { %2450 = vmatprep.subr.bf16.mxu1 %v2449_v28  ;;  %v232_v28 = vld [vmem:[#allocation6 + $0x4f0] sm:$0xff]  ;;  %v2439_v32 = vpack.c.bf16 %v215_v24, %v214_v23  ;;  %v318_v4 = vld [vmem:[#allocation6 + $0x7a0] sm:$0xff]  ;;  %v319_v5 = vld [vmem:[#allocation6 + $0x7a8] sm:$0xff] }
  0x6e   :  { %2420 = vmatpush3.bf16.msra.mxu0 %v2419_v35  ;;  %v2441_v34 = vpack.c.bf16 %v233_v29, %v232_v28  ;;  %v216_v35 = vld [vmem:[#allocation6 + $0x470] sm:$0xff]  ;;  %v55_v6 = vld [vmem:[#allocation3 + $0x68] sm:$0xff]  ;;  %v270_v11 = vld [vmem:[#allocation6 + $0x620] sm:$0xff] }
  0x6f   :  { %2422 = vmatprep.subr.bf16.mxu0 %v2421_v38  ;;  %v2473_v38 = vpack.c.bf16 %v265_v31, %v264_v30  ;;  %v2443_v44 = vpack.c.bf16 %v217_v36, %v216_v35  ;;  %v271_v12 = vld [vmem:[#allocation6 + $0x628] sm:$0xff]  ;;  %v302_v13 = vld [vmem:[#allocation6 + $0x720] sm:$0xff]  ;;  %v288_v16 = vld [vmem:[#allocation6 + $0x6b0] sm:$0xff] }
  0x70   :  { %2452 = vmatpush3.bf16.msra.mxu1 %v2451_v37  ;;  %v248_v37 = vld [vmem:[#allocation6 + $0x570] sm:$0xff]  ;;  %v303_v15 = vld [vmem:[#allocation6 + $0x728] sm:$0xff]  ;;  %v289_v17 = vld [vmem:[#allocation6 + $0x6b8] sm:$0xff] }
  0x71   :  { %2454 = vmatprep.subr.bf16.mxu1 %v2453_v42  ;;  %v314_v42 = vld [vmem:[#allocation6 + $0x780] sm:$0xff]  ;;  %v2475_v45 = vpack.c.bf16 %v249_v39, %v248_v37  ;;  %v320_v18 = vld [vmem:[#allocation6 + $0x7b0] sm:$0xff]  ;;  %v321_v19 = vld [vmem:[#allocation6 + $0x7b8] sm:$0xff] }
  0x72   :  { %2424 = vmatpush3.bf16.msra.mxu0 %v2423_v48  ;;  %v267_v48 = vld [vmem:[#allocation6 + $0x608] sm:$0xff]  ;;  %v272_v23 = vld [vmem:[#allocation6 + $0x630] sm:$0xff]  ;;  %v273_v24 = vld [vmem:[#allocation6 + $0x638] sm:$0xff] }
  0x73   :  { %2426 = vmatprep.subr.bf16.mxu0 %v2425_v50  ;;  %v2509_v50 = vpack.c.bf16 %v315_v43, %v314_v42  ;;  %v2479_v57 = vpack.c.bf16 %v267_v48, %v266_v47  ;;  %v304_v25 = vld [vmem:[#allocation6 + $0x730] sm:$0xff]  ;;  %v305_v27 = vld [vmem:[#allocation6 + $0x738] sm:$0xff]  ;;  %v290_v28 = vld [vmem:[#allocation6 + $0x6c0] sm:$0xff] }
  0x74   :  { %2456 = vmatpush3.bf16.msra.mxu1 %v2455_v49  ;;  %v298_v49 = vld [vmem:[#allocation6 + $0x700] sm:$0xff]  ;;  %v291_v29 = vld [vmem:[#allocation6 + $0x6c8] sm:$0xff]  ;;  %v292_v40 = vld [vmem:[#allocation6 + $0x6d0] sm:$0xff] }
  0x75   :  { %2458 = vmatprep.subr.bf16.mxu1 %v2457_v54  ;;  %v316_v54 = vld [vmem:[#allocation6 + $0x790] sm:$0xff]  ;;  %v2511_v59 = vpack.c.bf16 %v299_v51, %v298_v49  ;;  %v322_v30 = vld [vmem:[#allocation6 + $0x7c0] sm:$0xff]  ;;  %v323_v31 = vld [vmem:[#allocation6 + $0x7c8] sm:$0xff] }
  0x76   :  { %2428 = vmatpush3.bf16.msra.mxu0 %v2427_v60  ;;  %v2481_v60 = vpack.c.bf16 %v285_v53, %v284_v52  ;;  %v2513_v0 = vpack.c.bf16 %v317_v55, %v316_v54  ;;  %v274_v35 = vld [vmem:[#allocation6 + $0x640] sm:$0xff]  ;;  %v275_v36 = vld [vmem:[#allocation6 + $0x648] sm:$0xff]  ;;  %v293_v41 = vld [vmem:[#allocation6 + $0x6d8] sm:$0xff] }
  0x77   :  { %2430 = vmatprep.subr.bf16.mxu0 %v2429_v62  ;;  %v269_v62 = vld [vmem:[#allocation6 + $0x618] sm:$0xff]  ;;  %v306_v37 = vld [vmem:[#allocation6 + $0x740] sm:$0xff]  ;;  %v307_v39 = vld [vmem:[#allocation6 + $0x748] sm:$0xff] }
  0x78   :  { %2460 = vmatpush3.bf16.msra.mxu1 %v2459_v61  ;;  %v268_v61 = vld [vmem:[#allocation6 + $0x610] sm:$0xff]  ;;  %v325_v43 = vld [vmem:[#allocation6 + $0x7d8] sm:$0xff]  ;;  %v294_v52 = vld [vmem:[#allocation6 + $0x6e0] sm:$0xff] }
  0x79   :  { %2462 = vmatprep.subr.bf16.mxu1 %v2461_v2  ;;  %v286_v2 = vld [vmem:[#allocation6 + $0x6a0] sm:$0xff]  ;;  %v2483_v7 = vpack.c.bf16 %v269_v62, %v268_v61  ;;  %v324_v42 = vld [vmem:[#allocation6 + $0x7d0] sm:$0xff]  ;;  %v277_v48 = vld [vmem:[#allocation6 + $0x658] sm:$0xff] }
  0x7a   :  { %2432 = vmatpush3.bf16.msra.mxu0 %v2431_v8  ;;  %v57_v8 = vld [vmem:[#allocation3 + $0x78] sm:$0xff]  ;;  %v276_v47 = vld [vmem:[#allocation6 + $0x650] sm:$0xff]  ;;  %v295_v53 = vld [vmem:[#allocation6 + $0x6e8] sm:$0xff] }
  0x7b   :  { %2434 = vmatprep.subr.bf16.mxu0 %v2433_v10  ;;  %v2485_v10 = vpack.c.bf16 %v287_v3, %v286_v2  ;;  %v308_v49 = vld [vmem:[#allocation6 + $0x750] sm:$0xff]  ;;  %v309_v51 = vld [vmem:[#allocation6 + $0x758] sm:$0xff]  ;;  %v326_v54 = vld [vmem:[#allocation6 + $0x7e0] sm:$0xff] }
  0x7c   :  { %2464 = vmatpush3.bf16.msra.mxu1 %v2463_v9  ;;  %v2515_v9 = vpack.c.bf16 %v301_v1, %v300_v63  ;;  %v327_v55 = vld [vmem:[#allocation6 + $0x7e8] sm:$0xff]  ;;  %v310_v61 = vld [vmem:[#allocation6 + $0x760] sm:$0xff]  ;;  %v297_v1 = vld [vmem:[#allocation6 + $0x6f8] sm:$0xff] }
  0x7d   :  { %2466 = vmatprep.subr.bf16.mxu1 %v2465_v14  ;;  %v2517_v14 = vpack.c.bf16 %v319_v5, %v318_v4  ;;  %v2533_v62 = vpack.c.bf16 %v327_v55, %v326_v54  ;;  %v311_v63 = vld [vmem:[#allocation6 + $0x768] sm:$0xff]  ;;  %v328_v2 = vld [vmem:[#allocation6 + $0x7f0] sm:$0xff]  ;;  %v329_v3 = vld [vmem:[#allocation6 + $0x7f8] sm:$0xff] }
  0x7e   :  { %2436 = vmatpush3.bf16.msra.mxu0 %v2435_v20  ;;  %v2487_v20 = vpack.c.bf16 %v271_v12, %v270_v11  ;;  %v2535_v5 = vpack.c.bf16 %v311_v63, %v310_v61  ;;  %v313_v11 = vld [vmem:[#allocation6 + $0x778] sm:$0xff]  ;;  %v346_v12 = vld [vmem:[#allocation6 + $0x880] sm:$0xff]  ;;  %v384_v54 = vld [vmem:[#allocation6 + $0x9b0] sm:$0xff] }
  0x7f   :  { %2438 = vmatprep.subr.bf16.mxu0 %v2437_v22  ;;  %v2489_v22 = vpack.c.bf16 %v289_v17, %v288_v16  ;;  %v385_v55 = vld [vmem:[#allocation6 + $0x9b8] sm:$0xff]  ;;  %v368_v61 = vld [vmem:[#allocation6 + $0x930] sm:$0xff] }
  0x80   :  { %2468 = vmatpush3.bf16.msra.mxu1 %v2467_v21  ;;  %v2519_v21 = vpack.c.bf16 %v303_v15, %v302_v13  ;;  %v347_v13 = vld [vmem:[#allocation6 + $0x888] sm:$0xff]  ;;  %v369_v63 = vld [vmem:[#allocation6 + $0x938] sm:$0xff] }
  0x81   :  { %2470 = vmatprep.subr.bf16.mxu1 %v2469_v26  ;;  %v2521_v26 = vpack.c.bf16 %v321_v19, %v320_v18  ;;  %v379_v15 = vld [vmem:[#allocation6 + $0x988] sm:$0xff]  ;;  %v2541_v18 = vpack.c.bf16 %v347_v13, %v346_v12  ;;  %v330_v19 = vld [vmem:[#allocation6 + $0x800] sm:$0xff]  ;;  %v356_v12 = vld [vmem:[#allocation6 + $0x8d0] sm:$0xff] }
  0x82   :  { %2440 = vmatpush3.bf16.msra.mxu0 %v2439_v32  ;;  %v2491_v32 = vpack.c.bf16 %v273_v24, %v272_v23  ;;  %v363_v23 = vld [vmem:[#allocation6 + $0x908] sm:$0xff]  ;;  %v348_v24 = vld [vmem:[#allocation6 + $0x890] sm:$0xff]  ;;  %v357_v13 = vld [vmem:[#allocation6 + $0x8d8] sm:$0xff] }
  0x83   :  { %2442 = vmatprep.subr.bf16.mxu0 %v2441_v34  ;;  %v2493_v34 = vpack.c.bf16 %v291_v29, %v290_v28  ;;  %v54_v28 = vld [vmem:[#allocation3 + $0x60] sm:$0xff] }
  0x84   :  { %2472 = vmatpush3.bf16.msra.mxu1 %v2471_v33  ;;  %v2523_v33 = vpack.c.bf16 %v305_v27, %v304_v25  ;;  %v349_v25 = vld [vmem:[#allocation6 + $0x898] sm:$0xff] }
  0x85   :  { %2474 = vmatprep.subr.bf16.mxu1 %v2473_v38  ;;  %v2525_v38 = vpack.c.bf16 %v323_v31, %v322_v30  ;;  %v381_v27 = vld [vmem:[#allocation6 + $0x998] sm:$0xff]  ;;  %v56_v30 = vld [vmem:[#allocation3 + $0x70] sm:$0xff] }
  0x86   :  { %2444 = vmatpush3.bf16.msra.mxu0 %v2443_v44  ;;  %v2495_v44 = vpack.c.bf16 %v275_v36, %v274_v35  ;;  %v364_v35 = vld [vmem:[#allocation6 + $0x910] sm:$0xff] }
  0x87   :  { %2478 = vmatprep.subr.bf16.mxu0 %v2477_v46  ;;  %v2497_v46 = vpack.c.bf16 %v293_v41, %v292_v40  ;;  %v382_v40 = vld [vmem:[#allocation6 + $0x9a0] sm:$0xff]  ;;  %v383_v41 = vld [vmem:[#allocation6 + $0x9a8] sm:$0xff] }
  0x88   :  { %2476 = vmatpush3.bf16.msra.mxu1 %v2475_v45  ;;  %v2527_v45 = vpack.c.bf16 %v307_v39, %v306_v37  ;;  %v365_v37 = vld [vmem:[#allocation6 + $0x918] sm:$0xff]  ;;  %v351_v39 = vld [vmem:[#allocation6 + $0x8a8] sm:$0xff] }
  0x89   :  { %2510 = vmatprep.subr.bf16.mxu1 %v2509_v50  ;;  %933 = vmatmul.mubr.f32.vlgmr.msra.gmra.mrb[4].mxu0 %v50_v56  ;;  %v2529_v50 = vpack.c.bf16 %v325_v43, %v324_v42  ;;  %v2499_v56 = vpack.c.bf16 %v277_v48, %v276_v47  ;;  %v59_v42 = vld [vmem:[#allocation3 + $0x88] sm:$0xff]  ;;  %v334_v47 = vld [vmem:[#allocation6 + $0x820] sm:$0xff] }
  0x8a   :  { %2480 = vmatpush3.bf16.msra.mxu0 %v2479_v57  ;;  %1072 = vmatprep.mubr.f32.mxu0 %v55_v6  ;;  %v2531_v57 = vpack.c.bf16 %v309_v51, %v308_v49  ;;  %v335_v48 = vld [vmem:[#allocation6 + $0x828] sm:$0xff]  ;;  %v366_v49 = vld [vmem:[#allocation6 + $0x920] sm:$0xff] }
  0x8b   :  { %1003 = vmatmul.mubr.f32.vlgmr.msra.gmra.mrb[4].mxu1 %v52_v58  ;;  %2482 = vmatprep.subr.bf16.mxu0 %v2481_v60  ;;  %v2501_v58 = vpack.c.bf16 %v295_v53, %v294_v52  ;;  %v279_v60 = vld [vmem:[#allocation6 + $0x668] sm:$0xff]  ;;  %v352_v52 = vld [vmem:[#allocation6 + $0x8b0] sm:$0xff]  ;;  %v353_v53 = vld [vmem:[#allocation6 + $0x8b8] sm:$0xff] }
  0x8c   :  { %2512 = vmatpush3.bf16.msra.mxu1 %v2511_v59  ;;  %1142 = vmatprep.mubr.f32.mxu1 %v57_v8  ;;  %v278_v59 = vld [vmem:[#allocation6 + $0x660] sm:$0xff]  ;;  %v281_v8 = vld [vmem:[#allocation6 + $0x678] sm:$0xff]  ;;  %v367_v51 = vld [vmem:[#allocation6 + $0x928] sm:$0xff] }
  0x8d   :  { %2514 = vmatprep.subr.bf16.mxu1 %v2513_v0  ;;  %v296_v0 = vld [vmem:[#allocation6 + $0x6f0] sm:$0xff]  ;;  %v2503_v4 = vpack.c.bf16 %v279_v60, %v278_v59  ;;  %v337_v60 = vld [vmem:[#allocation6 + $0x838] sm:$0xff] }
  0x8e   :  { %2484 = vmatpush3.bf16.msra.mxu0 %v2483_v7  ;;  %v2505_v6 = vpack.c.bf16 %v297_v1, %v296_v0  ;;  %v280_v7 = vld [vmem:[#allocation6 + $0x670] sm:$0xff]  ;;  %v354_v0 = vld [vmem:[#allocation6 + $0x8c0] sm:$0xff]  ;;  %v355_v1 = vld [vmem:[#allocation6 + $0x8c8] sm:$0xff] }
  0x8f   :  { %2486 = vmatprep.subr.bf16.mxu0 %v2485_v10  ;;  %v2537_v10 = vpack.c.bf16 %v329_v3, %v328_v2  ;;  %v2507_v16 = vpack.c.bf16 %v281_v8, %v280_v7  ;;  %v336_v59 = vld [vmem:[#allocation6 + $0x830] sm:$0xff]  ;;  %v386_v2 = vld [vmem:[#allocation6 + $0x9c0] sm:$0xff]  ;;  %v387_v3 = vld [vmem:[#allocation6 + $0x9c8] sm:$0xff] }
  0x90   :  { %2516 = vmatpush3.bf16.msra.mxu1 %v2515_v9  ;;  %v312_v9 = vld [vmem:[#allocation6 + $0x770] sm:$0xff]  ;;  %v338_v7 = vld [vmem:[#allocation6 + $0x840] sm:$0xff]  ;;  %v339_v8 = vld [vmem:[#allocation6 + $0x848] sm:$0xff] }
  0x91   :  { %2518 = vmatprep.subr.bf16.mxu1 %v2517_v14  ;;  %v378_v14 = vld [vmem:[#allocation6 + $0x980] sm:$0xff]  ;;  %v2539_v17 = vpack.c.bf16 %v313_v11, %v312_v9  ;;  %v371_v11 = vld [vmem:[#allocation6 + $0x948] sm:$0xff] }
  0x92   :  { %2488 = vmatpush3.bf16.msra.mxu0 %v2487_v20  ;;  %v331_v20 = vld [vmem:[#allocation6 + $0x808] sm:$0xff]  ;;  %v370_v9 = vld [vmem:[#allocation6 + $0x940] sm:$0xff] }
  0x93   :  { %2490 = vmatprep.subr.bf16.mxu0 %v2489_v22  ;;  %v2573_v22 = vpack.c.bf16 %v379_v15, %v378_v14  ;;  %v2543_v29 = vpack.c.bf16 %v331_v20, %v330_v19  ;;  %v388_v14 = vld [vmem:[#allocation6 + $0x9d0] sm:$0xff]  ;;  %v389_v15 = vld [vmem:[#allocation6 + $0x9d8] sm:$0xff] }
  0x94   :  { %2520 = vmatpush3.bf16.msra.mxu1 %v2519_v21  ;;  %v362_v21 = vld [vmem:[#allocation6 + $0x900] sm:$0xff]  ;;  %v340_v19 = vld [vmem:[#allocation6 + $0x850] sm:$0xff]  ;;  %v341_v20 = vld [vmem:[#allocation6 + $0x858] sm:$0xff] }
  0x95   :  { %2522 = vmatprep.subr.bf16.mxu1 %v2521_v26  ;;  %v380_v26 = vld [vmem:[#allocation6 + $0x990] sm:$0xff]  ;;  %v2575_v31 = vpack.c.bf16 %v363_v23, %v362_v21  ;;  %v373_v23 = vld [vmem:[#allocation6 + $0x958] sm:$0xff] }
  0x96   :  { %2492 = vmatpush3.bf16.msra.mxu0 %v2491_v32  ;;  %v2545_v32 = vpack.c.bf16 %v349_v25, %v348_v24  ;;  %v2577_v36 = vpack.c.bf16 %v381_v27, %v380_v26  ;;  %v372_v21 = vld [vmem:[#allocation6 + $0x950] sm:$0xff]  ;;  %v358_v24 = vld [vmem:[#allocation6 + $0x8e0] sm:$0xff]  ;;  %v359_v25 = vld [vmem:[#allocation6 + $0x8e8] sm:$0xff] }
  0x97   :  { %2494 = vmatprep.subr.bf16.mxu0 %v2493_v34  ;;  %v333_v34 = vld [vmem:[#allocation6 + $0x818] sm:$0xff]  ;;  %v390_v26 = vld [vmem:[#allocation6 + $0x9e0] sm:$0xff]  ;;  %v391_v27 = vld [vmem:[#allocation6 + $0x9e8] sm:$0xff] }
  0x98   :  { %2524 = vmatpush3.bf16.msra.mxu1 %v2523_v33  ;;  %v332_v33 = vld [vmem:[#allocation6 + $0x810] sm:$0xff] }
  0x99   :  { %2526 = vmatprep.subr.bf16.mxu1 %v2525_v38  ;;  %v350_v38 = vld [vmem:[#allocation6 + $0x8a0] sm:$0xff]  ;;  %v2547_v43 = vpack.c.bf16 %v333_v34, %v332_v33  ;;  %v2597_v34 = vpack.c.bf16 %v391_v27, %v390_v26  ;;  %v448_v26 = vld [vmem:[#allocation6 + $0xbb0] sm:$0xff]  ;;  %v449_v27 = vld [vmem:[#allocation6 + $0xbb8] sm:$0xff] }
  0x9a   :  { %2496 = vmatpush3.bf16.msra.mxu0 %v2495_v44  ;;  %v61_v44 = vld [vmem:[#allocation3 + $0x98] sm:$0xff]  ;;  %v374_v33 = vld [vmem:[#allocation6 + $0x960] sm:$0xff] }
  0x9b   :  { %2498 = vmatprep.subr.bf16.mxu0 %v2497_v46  ;;  %v2549_v46 = vpack.c.bf16 %v351_v39, %v350_v38  ;;  %v392_v38 = vld [vmem:[#allocation6 + $0x9f0] sm:$0xff]  ;;  %v393_v39 = vld [vmem:[#allocation6 + $0x9f8] sm:$0xff] }
  0x9c   :  { %2528 = vmatpush3.bf16.msra.mxu1 %v2527_v45  ;;  %v2579_v45 = vpack.c.bf16 %v365_v37, %v364_v35  ;;  %v375_v35 = vld [vmem:[#allocation6 + $0x968] sm:$0xff]  ;;  %v361_v37 = vld [vmem:[#allocation6 + $0x8f8] sm:$0xff] }
  0x9d   :  { %2530 = vmatprep.subr.bf16.mxu1 %v2529_v50  ;;  %v2581_v50 = vpack.c.bf16 %v383_v41, %v382_v40  ;;  %v2599_v41 = vpack.c.bf16 %v375_v35, %v374_v33  ;;  %v432_v33 = vld [vmem:[#allocation6 + $0xb30] sm:$0xff]  ;;  %v433_v35 = vld [vmem:[#allocation6 + $0xb38] sm:$0xff] }
  0x9e   :  { %2500 = vmatpush3.bf16.msra.mxu0 %v2499_v56  ;;  %v2551_v56 = vpack.c.bf16 %v335_v48, %v334_v47  ;;  %v377_v47 = vld [vmem:[#allocation6 + $0x978] sm:$0xff]  ;;  %v410_v48 = vld [vmem:[#allocation6 + $0xa80] sm:$0xff] }
  0x9f   :  { %2502 = vmatprep.subr.bf16.mxu0 %v2501_v58  ;;  %v2553_v58 = vpack.c.bf16 %v353_v53, %v352_v52 }
  0xa0   :  { %2532 = vmatpush3.bf16.msra.mxu1 %v2531_v57  ;;  %v2583_v57 = vpack.c.bf16 %v367_v51, %v366_v49  ;;  %v411_v49 = vld [vmem:[#allocation6 + $0xa88] sm:$0xff] }
  0xa1   :  { %2534 = vmatprep.subr.bf16.mxu1 %v2533_v62  ;;  %v2585_v62 = vpack.c.bf16 %v385_v55, %v384_v54  ;;  %v443_v51 = vld [vmem:[#allocation6 + $0xb88] sm:$0xff]  ;;  %v2605_v54 = vpack.c.bf16 %v411_v49, %v410_v48  ;;  %v394_v55 = vld [vmem:[#allocation6 + $0xa00] sm:$0xff]  ;;  %v420_v48 = vld [vmem:[#allocation6 + $0xad0] sm:$0xff] }
  0xa2   :  { %2504 = vmatpush3.bf16.msra.mxu0 %v2503_v4  ;;  %v2555_v4 = vpack.c.bf16 %v337_v60, %v336_v59  ;;  %v427_v59 = vld [vmem:[#allocation6 + $0xb08] sm:$0xff]  ;;  %v412_v60 = vld [vmem:[#allocation6 + $0xa90] sm:$0xff]  ;;  %v421_v49 = vld [vmem:[#allocation6 + $0xad8] sm:$0xff] }
  0xa3   :  { %2506 = vmatprep.subr.bf16.mxu0 %v2505_v6  ;;  %v2557_v6 = vpack.c.bf16 %v355_v1, %v354_v0  ;;  %v58_v0 = vld [vmem:[#allocation3 + $0x80] sm:$0xff] }
  0xa4   :  { %2536 = vmatpush3.bf16.msra.mxu1 %v2535_v5  ;;  %v2587_v5 = vpack.c.bf16 %v369_v63, %v368_v61  ;;  %v413_v61 = vld [vmem:[#allocation6 + $0xa98] sm:$0xff] }
  0xa5   :  { %2538 = vmatprep.subr.bf16.mxu1 %v2537_v10  ;;  %v2589_v10 = vpack.c.bf16 %v387_v3, %v386_v2  ;;  %v445_v63 = vld [vmem:[#allocation6 + $0xb98] sm:$0xff]  ;;  %v60_v2 = vld [vmem:[#allocation3 + $0x90] sm:$0xff] }
  0xa6   :  { %2508 = vmatpush3.bf16.msra.mxu0 %v2507_v16  ;;  %v2559_v16 = vpack.c.bf16 %v339_v8, %v338_v7  ;;  %v428_v7 = vld [vmem:[#allocation6 + $0xb10] sm:$0xff] }
  0xa7   :  { %2542 = vmatprep.subr.bf16.mxu0 %v2541_v18  ;;  %v2561_v18 = vpack.c.bf16 %v357_v13, %v356_v12  ;;  %v446_v12 = vld [vmem:[#allocation6 + $0xba0] sm:$0xff]  ;;  %v447_v13 = vld [vmem:[#allocation6 + $0xba8] sm:$0xff] }
  0xa8   :  { %2540 = vmatpush3.bf16.msra.mxu1 %v2539_v17  ;;  %v2591_v17 = vpack.c.bf16 %v371_v11, %v370_v9  ;;  %v429_v9 = vld [vmem:[#allocation6 + $0xb18] sm:$0xff]  ;;  %v415_v11 = vld [vmem:[#allocation6 + $0xaa8] sm:$0xff] }
  0xa9   :  { %2574 = vmatprep.subr.bf16.mxu1 %v2573_v22  ;;  %1073 = vmatmul.mubr.f32.vlgmr.msra.gmra.mrb[6].mxu0 %v54_v28  ;;  %v2593_v22 = vpack.c.bf16 %v389_v15, %v388_v14  ;;  %v2563_v28 = vpack.c.bf16 %v341_v20, %v340_v19  ;;  %v63_v14 = vld [vmem:[#allocation3 + $0xa8] sm:$0xff]  ;;  %v398_v19 = vld [vmem:[#allocation6 + $0xa20] sm:$0xff] }
  0xaa   :  { %2544 = vmatpush3.bf16.msra.mxu0 %v2543_v29  ;;  %1212 = vmatprep.mubr.f32.mxu0 %v59_v42  ;;  %v2595_v29 = vpack.c.bf16 %v373_v23, %v372_v21  ;;  %v399_v20 = vld [vmem:[#allocation6 + $0xa28] sm:$0xff]  ;;  %v430_v21 = vld [vmem:[#allocation6 + $0xb20] sm:$0xff] }
  0xab   :  { %1143 = vmatmul.mubr.f32.vlgmr.msra.gmra.mrb[6].mxu1 %v56_v30  ;;  %2546 = vmatprep.subr.bf16.mxu0 %v2545_v32  ;;  %v2565_v30 = vpack.c.bf16 %v359_v25, %v358_v24  ;;  %v343_v32 = vld [vmem:[#allocation6 + $0x868] sm:$0xff]  ;;  %v416_v24 = vld [vmem:[#allocation6 + $0xab0] sm:$0xff]  ;;  %v417_v25 = vld [vmem:[#allocation6 + $0xab8] sm:$0xff] }
  0xac   :  { %2576 = vmatpush3.bf16.msra.mxu1 %v2575_v31  ;;  %1282 = vmatprep.mubr.f32.mxu1 %v61_v44  ;;  %v342_v31 = vld [vmem:[#allocation6 + $0x860] sm:$0xff]  ;;  %v345_v44 = vld [vmem:[#allocation6 + $0x878] sm:$0xff]  ;;  %v431_v23 = vld [vmem:[#allocation6 + $0xb28] sm:$0xff] }
  0xad   :  { %2578 = vmatprep.subr.bf16.mxu1 %v2577_v36  ;;  %v360_v36 = vld [vmem:[#allocation6 + $0x8f0] sm:$0xff]  ;;  %v2567_v40 = vpack.c.bf16 %v343_v32, %v342_v31  ;;  %v401_v32 = vld [vmem:[#allocation6 + $0xa38] sm:$0xff] }
  0xae   :  { %2548 = vmatpush3.bf16.msra.mxu0 %v2547_v43  ;;  %v2569_v42 = vpack.c.bf16 %v361_v37, %v360_v36  ;;  %v344_v43 = vld [vmem:[#allocation6 + $0x870] sm:$0xff]  ;;  %v418_v36 = vld [vmem:[#allocation6 + $0xac0] sm:$0xff]  ;;  %v419_v37 = vld [vmem:[#allocation6 + $0xac8] sm:$0xff] }
  0xaf   :  { %2550 = vmatprep.subr.bf16.mxu0 %v2549_v46  ;;  %v2601_v46 = vpack.c.bf16 %v393_v39, %v392_v38  ;;  %v2571_v52 = vpack.c.bf16 %v345_v44, %v344_v43  ;;  %v400_v31 = vld [vmem:[#allocation6 + $0xa30] sm:$0xff]  ;;  %v450_v38 = vld [vmem:[#allocation6 + $0xbc0] sm:$0xff]  ;;  %v451_v39 = vld [vmem:[#allocation6 + $0xbc8] sm:$0xff] }
  0xb0   :  { %2580 = vmatpush3.bf16.msra.mxu1 %v2579_v45  ;;  %v376_v45 = vld [vmem:[#allocation6 + $0x970] sm:$0xff]  ;;  %v402_v43 = vld [vmem:[#allocation6 + $0xa40] sm:$0xff]  ;;  %v403_v44 = vld [vmem:[#allocation6 + $0xa48] sm:$0xff] }
  0xb1   :  { %2582 = vmatprep.subr.bf16.mxu1 %v2581_v50  ;;  %v442_v50 = vld [vmem:[#allocation6 + $0xb80] sm:$0xff]  ;;  %v2603_v53 = vpack.c.bf16 %v377_v47, %v376_v45  ;;  %v435_v47 = vld [vmem:[#allocation6 + $0xb48] sm:$0xff] }
  0xb2   :  { %2552 = vmatpush3.bf16.msra.mxu0 %v2551_v56  ;;  %v395_v56 = vld [vmem:[#allocation6 + $0xa08] sm:$0xff]  ;;  %v434_v45 = vld [vmem:[#allocation6 + $0xb40] sm:$0xff] }
  0xb3   :  { %2554 = vmatprep.subr.bf16.mxu0 %v2553_v58  ;;  %v2637_v58 = vpack.c.bf16 %v443_v51, %v442_v50  ;;  %v2607_v1 = vpack.c.bf16 %v395_v56, %v394_v55  ;;  %v452_v50 = vld [vmem:[#allocation6 + $0xbd0] sm:$0xff]  ;;  %v453_v51 = vld [vmem:[#allocation6 + $0xbd8] sm:$0xff] }
  0xb4   :  { %2584 = vmatpush3.bf16.msra.mxu1 %v2583_v57  ;;  %v426_v57 = vld [vmem:[#allocation6 + $0xb00] sm:$0xff]  ;;  %v404_v55 = vld [vmem:[#allocation6 + $0xa50] sm:$0xff]  ;;  %v405_v56 = vld [vmem:[#allocation6 + $0xa58] sm:$0xff] }
  0xb5   :  { %2586 = vmatprep.subr.bf16.mxu1 %v2585_v62  ;;  %v444_v62 = vld [vmem:[#allocation6 + $0xb90] sm:$0xff]  ;;  %v2639_v3 = vpack.c.bf16 %v427_v59, %v426_v57  ;;  %v437_v59 = vld [vmem:[#allocation6 + $0xb58] sm:$0xff] }
  0xb6   :  { %2556 = vmatpush3.bf16.msra.mxu0 %v2555_v4  ;;  %v2609_v4 = vpack.c.bf16 %v413_v61, %v412_v60  ;;  %v2641_v8 = vpack.c.bf16 %v445_v63, %v444_v62  ;;  %v436_v57 = vld [vmem:[#allocation6 + $0xb50] sm:$0xff]  ;;  %v422_v60 = vld [vmem:[#allocation6 + $0xae0] sm:$0xff]  ;;  %v423_v61 = vld [vmem:[#allocation6 + $0xae8] sm:$0xff] }
  0xb7   :  { %2558 = vmatprep.subr.bf16.mxu0 %v2557_v6  ;;  %v397_v6 = vld [vmem:[#allocation6 + $0xa18] sm:$0xff]  ;;  %v454_v62 = vld [vmem:[#allocation6 + $0xbe0] sm:$0xff]  ;;  %v455_v63 = vld [vmem:[#allocation6 + $0xbe8] sm:$0xff] }
  0xb8   :  { %2588 = vmatpush3.bf16.msra.mxu1 %v2587_v5  ;;  %v396_v5 = vld [vmem:[#allocation6 + $0xa10] sm:$0xff] }
  0xb9   :  { %2590 = vmatprep.subr.bf16.mxu1 %v2589_v10  ;;  %v414_v10 = vld [vmem:[#allocation6 + $0xaa0] sm:$0xff]  ;;  %v2611_v15 = vpack.c.bf16 %v397_v6, %v396_v5  ;;  %v2661_v6 = vpack.c.bf16 %v455_v63, %v454_v62  ;;  %v512_v62 = vld [vmem:[#allocation6 + $0xdb0] sm:$0xff]  ;;  %v513_v63 = vld [vmem:[#allocation6 + $0xdb8] sm:$0xff] }
  0xba   :  { %2560 = vmatpush3.bf16.msra.mxu0 %v2559_v16  ;;  %v65_v16 = vld [vmem:[#allocation3 + $0xb8] sm:$0xff]  ;;  %v438_v5 = vld [vmem:[#allocation6 + $0xb60] sm:$0xff] }
  0xbb   :  { %2562 = vmatprep.subr.bf16.mxu0 %v2561_v18  ;;  %v2613_v18 = vpack.c.bf16 %v415_v11, %v414_v10  ;;  %v456_v10 = vld [vmem:[#allocation6 + $0xbf0] sm:$0xff]  ;;  %v457_v11 = vld [vmem:[#allocation6 + $0xbf8] sm:$0xff] }
  0xbc   :  { %2592 = vmatpush3.bf16.msra.mxu1 %v2591_v17  ;;  %v2643_v17 = vpack.c.bf16 %v429_v9, %v428_v7  ;;  %v439_v7 = vld [vmem:[#allocation6 + $0xb68] sm:$0xff]  ;;  %v425_v9 = vld [vmem:[#allocation6 + $0xaf8] sm:$0xff] }
  0xbd   :  { %2594 = vmatprep.subr.bf16.mxu1 %v2593_v22  ;;  %v2645_v22 = vpack.c.bf16 %v447_v13, %v446_v12  ;;  %v2663_v13 = vpack.c.bf16 %v439_v7, %v438_v5  ;;  %v496_v5 = vld [vmem:[#allocation6 + $0xd30] sm:$0xff]  ;;  %v497_v7 = vld [vmem:[#allocation6 + $0xd38] sm:$0xff] }
  0xbe   :  { %2564 = vmatpush3.bf16.msra.mxu0 %v2563_v28  ;;  %v2615_v28 = vpack.c.bf16 %v399_v20, %v398_v19  ;;  %v441_v19 = vld [vmem:[#allocation6 + $0xb78] sm:$0xff]  ;;  %v474_v20 = vld [vmem:[#allocation6 + $0xc80] sm:$0xff] }
  0xbf   :  { %2566 = vmatprep.subr.bf16.mxu0 %v2565_v30  ;;  %v2617_v30 = vpack.c.bf16 %v417_v25, %v416_v24 }
  0xc0   :  { %2596 = vmatpush3.bf16.msra.mxu1 %v2595_v29  ;;  %v2647_v29 = vpack.c.bf16 %v431_v23, %v430_v21  ;;  %v475_v21 = vld [vmem:[#allocation6 + $0xc88] sm:$0xff] }
  0xc1   :  { %2598 = vmatprep.subr.bf16.mxu1 %v2597_v34  ;;  %v2649_v34 = vpack.c.bf16 %v449_v27, %v448_v26  ;;  %v507_v23 = vld [vmem:[#allocation6 + $0xd88] sm:$0xff]  ;;  %v2669_v26 = vpack.c.bf16 %v475_v21, %v474_v20  ;;  %v458_v27 = vld [vmem:[#allocation6 + $0xc00] sm:$0xff]  ;;  %v484_v20 = vld [vmem:[#allocation6 + $0xcd0] sm:$0xff] }
  0xc2   :  { %2568 = vmatpush3.bf16.msra.mxu0 %v2567_v40  ;;  %v2619_v40 = vpack.c.bf16 %v401_v32, %v400_v31  ;;  %v491_v31 = vld [vmem:[#allocation6 + $0xd08] sm:$0xff]  ;;  %v476_v32 = vld [vmem:[#allocation6 + $0xc90] sm:$0xff]  ;;  %v485_v21 = vld [vmem:[#allocation6 + $0xcd8] sm:$0xff] }
  0xc3   :  { %2570 = vmatprep.subr.bf16.mxu0 %v2569_v42  ;;  %v2621_v42 = vpack.c.bf16 %v419_v37, %v418_v36  ;;  %v62_v36 = vld [vmem:[#allocation3 + $0xa0] sm:$0xff] }
  0xc4   :  { %2600 = vmatpush3.bf16.msra.mxu1 %v2599_v41  ;;  %v2651_v41 = vpack.c.bf16 %v433_v35, %v432_v33  ;;  %v477_v33 = vld [vmem:[#allocation6 + $0xc98] sm:$0xff] }
  0xc5   :  { %2602 = vmatprep.subr.bf16.mxu1 %v2601_v46  ;;  %v2653_v46 = vpack.c.bf16 %v451_v39, %v450_v38  ;;  %v509_v35 = vld [vmem:[#allocation6 + $0xd98] sm:$0xff]  ;;  %v64_v38 = vld [vmem:[#allocation3 + $0xb0] sm:$0xff] }
  0xc6   :  { %2572 = vmatpush3.bf16.msra.mxu0 %v2571_v52  ;;  %v2623_v52 = vpack.c.bf16 %v403_v44, %v402_v43  ;;  %v492_v43 = vld [vmem:[#allocation6 + $0xd10] sm:$0xff] }
  0xc7   :  { %2606 = vmatprep.subr.bf16.mxu0 %v2605_v54  ;;  %v2625_v54 = vpack.c.bf16 %v421_v49, %v420_v48  ;;  %v510_v48 = vld [vmem:[#allocation6 + $0xda0] sm:$0xff]  ;;  %v511_v49 = vld [vmem:[#allocation6 + $0xda8] sm:$0xff] }
  0xc8   :  { %2604 = vmatpush3.bf16.msra.mxu1 %v2603_v53  ;;  %v2655_v53 = vpack.c.bf16 %v435_v47, %v434_v45  ;;  %v493_v45 = vld [vmem:[#allocation6 + $0xd18] sm:$0xff]  ;;  %v479_v47 = vld [vmem:[#allocation6 + $0xca8] sm:$0xff] }
  0xc9   :  { %2638 = vmatprep.subr.bf16.mxu1 %v2637_v58  ;;  %1213 = vmatmul.mubr.f32.vlgmr.msra.gmra.mrb[8].mxu0 %v58_v0  ;;  %v2657_v58 = vpack.c.bf16 %v453_v51, %v452_v50  ;;  %v2627_v0 = vpack.c.bf16 %v405_v56, %v404_v55  ;;  %v67_v50 = vld [vmem:[#allocation3 + $0xc8] sm:$0xff]  ;;  %v462_v55 = vld [vmem:[#allocation6 + $0xc20] sm:$0xff] }
  0xca   :  { %2608 = vmatpush3.bf16.msra.mxu0 %v2607_v1  ;;  %1352 = vmatprep.mubr.f32.mxu0 %v63_v14  ;;  %v2659_v1 = vpack.c.bf16 %v437_v59, %v436_v57  ;;  %v463_v56 = vld [vmem:[#allocation6 + $0xc28] sm:$0xff]  ;;  %v494_v57 = vld [vmem:[#allocation6 + $0xd20] sm:$0xff] }
  0xcb   :  { %1283 = vmatmul.mubr.f32.vlgmr.msra.gmra.mrb[8].mxu1 %v60_v2  ;;  %2610 = vmatprep.subr.bf16.mxu0 %v2609_v4  ;;  %v2629_v2 = vpack.c.bf16 %v423_v61, %v422_v60  ;;  %v407_v4 = vld [vmem:[#allocation6 + $0xa68] sm:$0xff]  ;;  %v480_v60 = vld [vmem:[#allocation6 + $0xcb0] sm:$0xff]  ;;  %v481_v61 = vld [vmem:[#allocation6 + $0xcb8] sm:$0xff] }
  0xcc   :  { %2640 = vmatpush3.bf16.msra.mxu1 %v2639_v3  ;;  %1422 = vmatprep.mubr.f32.mxu1 %v65_v16  ;;  %v406_v3 = vld [vmem:[#allocation6 + $0xa60] sm:$0xff]  ;;  %v409_v16 = vld [vmem:[#allocation6 + $0xa78] sm:$0xff]  ;;  %v495_v59 = vld [vmem:[#allocation6 + $0xd28] sm:$0xff] }
  0xcd   :  { %2642 = vmatprep.subr.bf16.mxu1 %v2641_v8  ;;  %v424_v8 = vld [vmem:[#allocation6 + $0xaf0] sm:$0xff]  ;;  %v2631_v12 = vpack.c.bf16 %v407_v4, %v406_v3  ;;  %v465_v4 = vld [vmem:[#allocation6 + $0xc38] sm:$0xff] }
  0xce   :  { %2612 = vmatpush3.bf16.msra.mxu0 %v2611_v15  ;;  %v2633_v14 = vpack.c.bf16 %v425_v9, %v424_v8  ;;  %v408_v15 = vld [vmem:[#allocation6 + $0xa70] sm:$0xff]  ;;  %v482_v8 = vld [vmem:[#allocation6 + $0xcc0] sm:$0xff]  ;;  %v483_v9 = vld [vmem:[#allocation6 + $0xcc8] sm:$0xff] }
  0xcf   :  { %2614 = vmatprep.subr.bf16.mxu0 %v2613_v18  ;;  %v2665_v18 = vpack.c.bf16 %v457_v11, %v456_v10  ;;  %v2635_v24 = vpack.c.bf16 %v409_v16, %v408_v15  ;;  %v464_v3 = vld [vmem:[#allocation6 + $0xc30] sm:$0xff]  ;;  %v514_v10 = vld [vmem:[#allocation6 + $0xdc0] sm:$0xff]  ;;  %v515_v11 = vld [vmem:[#allocation6 + $0xdc8] sm:$0xff] }
  0xd0   :  { %2644 = vmatpush3.bf16.msra.mxu1 %v2643_v17  ;;  %v440_v17 = vld [vmem:[#allocation6 + $0xb70] sm:$0xff]  ;;  %v466_v15 = vld [vmem:[#allocation6 + $0xc40] sm:$0xff]  ;;  %v467_v16 = vld [vmem:[#allocation6 + $0xc48] sm:$0xff] }
  0xd1   :  { %2646 = vmatprep.subr.bf16.mxu1 %v2645_v22  ;;  %v506_v22 = vld [vmem:[#allocation6 + $0xd80] sm:$0xff]  ;;  %v2667_v25 = vpack.c.bf16 %v441_v19, %v440_v17  ;;  %v499_v19 = vld [vmem:[#allocation6 + $0xd48] sm:$0xff] }
  0xd2   :  { %2616 = vmatpush3.bf16.msra.mxu0 %v2615_v28  ;;  %v459_v28 = vld [vmem:[#allocation6 + $0xc08] sm:$0xff]  ;;  %v498_v17 = vld [vmem:[#allocation6 + $0xd40] sm:$0xff] }
  0xd3   :  { %2618 = vmatprep.subr.bf16.mxu0 %v2617_v30  ;;  %v2701_v30 = vpack.c.bf16 %v507_v23, %v506_v22  ;;  %v2671_v37 = vpack.c.bf16 %v459_v28, %v458_v27  ;;  %v516_v22 = vld [vmem:[#allocation6 + $0xdd0] sm:$0xff]  ;;  %v517_v23 = vld [vmem:[#allocation6 + $0xdd8] sm:$0xff] }
  0xd4   :  { %2648 = vmatpush3.bf16.msra.mxu1 %v2647_v29  ;;  %v490_v29 = vld [vmem:[#allocation6 + $0xd00] sm:$0xff]  ;;  %v468_v27 = vld [vmem:[#allocation6 + $0xc50] sm:$0xff]  ;;  %v469_v28 = vld [vmem:[#allocation6 + $0xc58] sm:$0xff] }
  0xd5   :  { %2650 = vmatprep.subr.bf16.mxu1 %v2649_v34  ;;  %v508_v34 = vld [vmem:[#allocation6 + $0xd90] sm:$0xff]  ;;  %v2703_v39 = vpack.c.bf16 %v491_v31, %v490_v29  ;;  %v501_v31 = vld [vmem:[#allocation6 + $0xd58] sm:$0xff] }
  0xd6   :  { %2620 = vmatpush3.bf16.msra.mxu0 %v2619_v40  ;;  %v2673_v40 = vpack.c.bf16 %v477_v33, %v476_v32  ;;  %v2705_v44 = vpack.c.bf16 %v509_v35, %v508_v34  ;;  %v500_v29 = vld [vmem:[#allocation6 + $0xd50] sm:$0xff]  ;;  %v486_v32 = vld [vmem:[#allocation6 + $0xce0] sm:$0xff]  ;;  %v487_v33 = vld [vmem:[#allocation6 + $0xce8] sm:$0xff] }
  0xd7   :  { %2622 = vmatprep.subr.bf16.mxu0 %v2621_v42  ;;  %v461_v42 = vld [vmem:[#allocation6 + $0xc18] sm:$0xff]  ;;  %v518_v34 = vld [vmem:[#allocation6 + $0xde0] sm:$0xff]  ;;  %v519_v35 = vld [vmem:[#allocation6 + $0xde8] sm:$0xff] }
  0xd8   :  { %2652 = vmatpush3.bf16.msra.mxu1 %v2651_v41  ;;  %v460_v41 = vld [vmem:[#allocation6 + $0xc10] sm:$0xff] }
  0xd9   :  { %2654 = vmatprep.subr.bf16.mxu1 %v2653_v46  ;;  %v478_v46 = vld [vmem:[#allocation6 + $0xca0] sm:$0xff]  ;;  %v2675_v51 = vpack.c.bf16 %v461_v42, %v460_v41  ;;  %v2725_v42 = vpack.c.bf16 %v519_v35, %v518_v34  ;;  %v576_v34 = vld [vmem:[#allocation6 + $0xfb0] sm:$0xff]  ;;  %v577_v35 = vld [vmem:[#allocation6 + $0xfb8] sm:$0xff] }
  0xda   :  { %2624 = vmatpush3.bf16.msra.mxu0 %v2623_v52  ;;  %v69_v52 = vld [vmem:[#allocation3 + $0xd8] sm:$0xff]  ;;  %v502_v41 = vld [vmem:[#allocation6 + $0xd60] sm:$0xff] }
  0xdb   :  { %2626 = vmatprep.subr.bf16.mxu0 %v2625_v54  ;;  %v2677_v54 = vpack.c.bf16 %v479_v47, %v478_v46  ;;  %v520_v46 = vld [vmem:[#allocation6 + $0xdf0] sm:$0xff]  ;;  %v521_v47 = vld [vmem:[#allocation6 + $0xdf8] sm:$0xff] }
  0xdc   :  { %2656 = vmatpush3.bf16.msra.mxu1 %v2655_v53  ;;  %v2707_v53 = vpack.c.bf16 %v493_v45, %v492_v43  ;;  %v503_v43 = vld [vmem:[#allocation6 + $0xd68] sm:$0xff]  ;;  %v489_v45 = vld [vmem:[#allocation6 + $0xcf8] sm:$0xff] }
  0xdd   :  { %2658 = vmatprep.subr.bf16.mxu1 %v2657_v58  ;;  %v2709_v58 = vpack.c.bf16 %v511_v49, %v510_v48  ;;  %v2727_v49 = vpack.c.bf16 %v503_v43, %v502_v41  ;;  %v560_v41 = vld [vmem:[#allocation6 + $0xf30] sm:$0xff]  ;;  %v561_v43 = vld [vmem:[#allocation6 + $0xf38] sm:$0xff] }
  0xde   :  { %2628 = vmatpush3.bf16.msra.mxu0 %v2627_v0  ;;  %v2679_v0 = vpack.c.bf16 %v463_v56, %v462_v55  ;;  %v505_v55 = vld [vmem:[#allocation6 + $0xd78] sm:$0xff]  ;;  %v538_v56 = vld [vmem:[#allocation6 + $0xe80] sm:$0xff] }
  0xdf   :  { %2630 = vmatprep.subr.bf16.mxu0 %v2629_v2  ;;  %v2681_v2 = vpack.c.bf16 %v481_v61, %v480_v60 }
  0xe0   :  { %2660 = vmatpush3.bf16.msra.mxu1 %v2659_v1  ;;  %v2711_v1 = vpack.c.bf16 %v495_v59, %v494_v57  ;;  %v539_v57 = vld [vmem:[#allocation6 + $0xe88] sm:$0xff] }
  0xe1   :  { %2662 = vmatprep.subr.bf16.mxu1 %v2661_v6  ;;  %v2713_v6 = vpack.c.bf16 %v513_v63, %v512_v62  ;;  %v571_v59 = vld [vmem:[#allocation6 + $0xf88] sm:$0xff]  ;;  %v2733_v62 = vpack.c.bf16 %v539_v57, %v538_v56  ;;  %v522_v63 = vld [vmem:[#allocation6 + $0xe00] sm:$0xff]  ;;  %v548_v56 = vld [vmem:[#allocation6 + $0xed0] sm:$0xff] }
  0xe2   :  { %2632 = vmatpush3.bf16.msra.mxu0 %v2631_v12  ;;  %v2683_v12 = vpack.c.bf16 %v465_v4, %v464_v3  ;;  %v555_v3 = vld [vmem:[#allocation6 + $0xf08] sm:$0xff]  ;;  %v540_v4 = vld [vmem:[#allocation6 + $0xe90] sm:$0xff]  ;;  %v549_v57 = vld [vmem:[#allocation6 + $0xed8] sm:$0xff] }
  0xe3   :  { %2634 = vmatprep.subr.bf16.mxu0 %v2633_v14  ;;  %v2685_v14 = vpack.c.bf16 %v483_v9, %v482_v8  ;;  %v66_v8 = vld [vmem:[#allocation3 + $0xc0] sm:$0xff] }
  0xe4   :  { %2664 = vmatpush3.bf16.msra.mxu1 %v2663_v13  ;;  %v2715_v13 = vpack.c.bf16 %v497_v7, %v496_v5  ;;  %v541_v5 = vld [vmem:[#allocation6 + $0xe98] sm:$0xff] }
  0xe5   :  { %2666 = vmatprep.subr.bf16.mxu1 %v2665_v18  ;;  %v2717_v18 = vpack.c.bf16 %v515_v11, %v514_v10  ;;  %v573_v7 = vld [vmem:[#allocation6 + $0xf98] sm:$0xff]  ;;  %v68_v10 = vld [vmem:[#allocation3 + $0xd0] sm:$0xff] }
  0xe6   :  { %2636 = vmatpush3.bf16.msra.mxu0 %v2635_v24  ;;  %v2687_v24 = vpack.c.bf16 %v467_v16, %v466_v15  ;;  %v556_v15 = vld [vmem:[#allocation6 + $0xf10] sm:$0xff] }
  0xe7   :  { %2670 = vmatprep.subr.bf16.mxu0 %v2669_v26  ;;  %v2689_v26 = vpack.c.bf16 %v485_v21, %v484_v20  ;;  %v574_v20 = vld [vmem:[#allocation6 + $0xfa0] sm:$0xff]  ;;  %v575_v21 = vld [vmem:[#allocation6 + $0xfa8] sm:$0xff] }
  0xe8   :  { %2668 = vmatpush3.bf16.msra.mxu1 %v2667_v25  ;;  %v2719_v25 = vpack.c.bf16 %v499_v19, %v498_v17  ;;  %v557_v17 = vld [vmem:[#allocation6 + $0xf18] sm:$0xff]  ;;  %v543_v19 = vld [vmem:[#allocation6 + $0xea8] sm:$0xff] }
  0xe9   :  { %2702 = vmatprep.subr.bf16.mxu1 %v2701_v30  ;;  %1353 = vmatmul.mubr.f32.vlgmr.msra.gmra.mrb[10].mxu0 %v62_v36  ;;  %v2721_v30 = vpack.c.bf16 %v517_v23, %v516_v22  ;;  %v2691_v36 = vpack.c.bf16 %v469_v28, %v468_v27  ;;  %v71_v22 = vld [vmem:[#allocation3 + $0xe8] sm:$0xff]  ;;  %v526_v27 = vld [vmem:[#allocation6 + $0xe20] sm:$0xff] }
  0xea   :  { %2672 = vmatpush3.bf16.msra.mxu0 %v2671_v37  ;;  %1492 = vmatprep.mubr.f32.mxu0 %v67_v50  ;;  %v2723_v37 = vpack.c.bf16 %v501_v31, %v500_v29  ;;  %v527_v28 = vld [vmem:[#allocation6 + $0xe28] sm:$0xff]  ;;  %v558_v29 = vld [vmem:[#allocation6 + $0xf20] sm:$0xff] }
  0xeb   :  { %1423 = vmatmul.mubr.f32.vlgmr.msra.gmra.mrb[10].mxu1 %v64_v38  ;;  %2674 = vmatprep.subr.bf16.mxu0 %v2673_v40  ;;  %v2693_v38 = vpack.c.bf16 %v487_v33, %v486_v32  ;;  %v471_v40 = vld [vmem:[#allocation6 + $0xc68] sm:$0xff]  ;;  %v544_v32 = vld [vmem:[#allocation6 + $0xeb0] sm:$0xff]  ;;  %v545_v33 = vld [vmem:[#allocation6 + $0xeb8] sm:$0xff] }
  0xec   :  { %2704 = vmatpush3.bf16.msra.mxu1 %v2703_v39  ;;  %1562 = vmatprep.mubr.f32.mxu1 %v69_v52  ;;  %v470_v39 = vld [vmem:[#allocation6 + $0xc60] sm:$0xff]  ;;  %v473_v52 = vld [vmem:[#allocation6 + $0xc78] sm:$0xff]  ;;  %v559_v31 = vld [vmem:[#allocation6 + $0xf28] sm:$0xff] }
  0xed   :  { %2706 = vmatprep.subr.bf16.mxu1 %v2705_v44  ;;  %v488_v44 = vld [vmem:[#allocation6 + $0xcf0] sm:$0xff]  ;;  %v2695_v48 = vpack.c.bf16 %v471_v40, %v470_v39  ;;  %v529_v40 = vld [vmem:[#allocation6 + $0xe38] sm:$0xff] }
  0xee   :  { %2676 = vmatpush3.bf16.msra.mxu0 %v2675_v51  ;;  %v2697_v50 = vpack.c.bf16 %v489_v45, %v488_v44  ;;  %v472_v51 = vld [vmem:[#allocation6 + $0xc70] sm:$0xff]  ;;  %v546_v44 = vld [vmem:[#allocation6 + $0xec0] sm:$0xff]  ;;  %v547_v45 = vld [vmem:[#allocation6 + $0xec8] sm:$0xff] }
  0xef   :  { %2678 = vmatprep.subr.bf16.mxu0 %v2677_v54  ;;  %v2729_v54 = vpack.c.bf16 %v521_v47, %v520_v46  ;;  %v2699_v60 = vpack.c.bf16 %v473_v52, %v472_v51  ;;  %v528_v39 = vld [vmem:[#allocation6 + $0xe30] sm:$0xff]  ;;  %v578_v46 = vld [vmem:[#allocation6 + $0xfc0] sm:$0xff]  ;;  %v579_v47 = vld [vmem:[#allocation6 + $0xfc8] sm:$0xff] }
  0xf0   :  { %2708 = vmatpush3.bf16.msra.mxu1 %v2707_v53  ;;  %v504_v53 = vld [vmem:[#allocation6 + $0xd70] sm:$0xff]  ;;  %v530_v51 = vld [vmem:[#allocation6 + $0xe40] sm:$0xff]  ;;  %v531_v52 = vld [vmem:[#allocation6 + $0xe48] sm:$0xff] }
  0xf1   :  { %2710 = vmatprep.subr.bf16.mxu1 %v2709_v58  ;;  %v570_v58 = vld [vmem:[#allocation6 + $0xf80] sm:$0xff]  ;;  %v2731_v61 = vpack.c.bf16 %v505_v55, %v504_v53  ;;  %v563_v55 = vld [vmem:[#allocation6 + $0xf48] sm:$0xff] }
  0xf2   :  { %2680 = vmatpush3.bf16.msra.mxu0 %v2679_v0  ;;  %v523_v0 = vld [vmem:[#allocation6 + $0xe08] sm:$0xff]  ;;  %v562_v53 = vld [vmem:[#allocation6 + $0xf40] sm:$0xff] }
  0xf3   :  { %2682 = vmatprep.subr.bf16.mxu0 %v2681_v2  ;;  %v2765_v2 = vpack.c.bf16 %v571_v59, %v570_v58  ;;  %v2735_v9 = vpack.c.bf16 %v523_v0, %v522_v63  ;;  %v580_v58 = vld [vmem:[#allocation6 + $0xfd0] sm:$0xff]  ;;  %v581_v59 = vld [vmem:[#allocation6 + $0xfd8] sm:$0xff] }
  0xf4   :  { %2712 = vmatpush3.bf16.msra.mxu1 %v2711_v1  ;;  %v554_v1 = vld [vmem:[#allocation6 + $0xf00] sm:$0xff]  ;;  %v532_v63 = vld [vmem:[#allocation6 + $0xe50] sm:$0xff]  ;;  %v533_v0 = vld [vmem:[#allocation6 + $0xe58] sm:$0xff] }
  0xf5   :  { %2714 = vmatprep.subr.bf16.mxu1 %v2713_v6  ;;  %v572_v6 = vld [vmem:[#allocation6 + $0xf90] sm:$0xff]  ;;  %v2767_v11 = vpack.c.bf16 %v555_v3, %v554_v1  ;;  %v565_v3 = vld [vmem:[#allocation6 + $0xf58] sm:$0xff] }
  0xf6   :  { %2684 = vmatpush3.bf16.msra.mxu0 %v2683_v12  ;;  %v2737_v12 = vpack.c.bf16 %v541_v5, %v540_v4  ;;  %v2769_v16 = vpack.c.bf16 %v573_v7, %v572_v6  ;;  %v564_v1 = vld [vmem:[#allocation6 + $0xf50] sm:$0xff]  ;;  %v550_v4 = vld [vmem:[#allocation6 + $0xee0] sm:$0xff]  ;;  %v551_v5 = vld [vmem:[#allocation6 + $0xee8] sm:$0xff] }
  0xf7   :  { %2686 = vmatprep.subr.bf16.mxu0 %v2685_v14  ;;  %v525_v14 = vld [vmem:[#allocation6 + $0xe18] sm:$0xff]  ;;  %v582_v6 = vld [vmem:[#allocation6 + $0xfe0] sm:$0xff]  ;;  %v583_v7 = vld [vmem:[#allocation6 + $0xfe8] sm:$0xff] }
  0xf8   :  { %2716 = vmatpush3.bf16.msra.mxu1 %v2715_v13  ;;  %v524_v13 = vld [vmem:[#allocation6 + $0xe10] sm:$0xff] }
  0xf9   :  { %2718 = vmatprep.subr.bf16.mxu1 %v2717_v18  ;;  %v542_v18 = vld [vmem:[#allocation6 + $0xea0] sm:$0xff]  ;;  %v2739_v23 = vpack.c.bf16 %v525_v14, %v524_v13 }
  0xfa   :  { %2688 = vmatpush3.bf16.msra.mxu0 %v2687_v24  ;;  %v73_v24 = vld [vmem:[#allocation3 + $0xf8] sm:$0xff]  ;;  %v566_v13 = vld [vmem:[#allocation6 + $0xf60] sm:$0xff] }
  0xfb   :  { %2690 = vmatprep.subr.bf16.mxu0 %v2689_v26  ;;  %v2741_v26 = vpack.c.bf16 %v543_v19, %v542_v18  ;;  %v553_v18 = vld [vmem:[#allocation6 + $0xef8] sm:$0xff]  ;;  %v587_v19 = vstv %s2947_s2  ;;  %s2878_s2 = smov [#allocation8]  }
  0xfc   :  { %2720 = vmatpush3.bf16.msra.mxu1 %v2719_v25  ;;  %v2771_v25 = vpack.c.bf16 %v557_v17, %v556_v15  ;;  %v2789_v15 = vpack.c.bf16 %v583_v7, %v582_v6  ;;  %v552_v17 = vld [vmem:[#allocation6 + $0xef0] sm:$0xff]  ;;  %s1715_s11 = sshll.u32 %s2878_s2, 4  ;;  %s1716_s11 = int_to_ptr.vmem [resolvable:$true] %s1715_s11 }
  0xfd   :  { %2722 = vmatprep.subr.bf16.mxu1 %v2721_v30  ;;  %v2773_v30 = vpack.c.bf16 %v575_v21, %v574_v20  ;;  %s2846_s12 = scalar_lea.vmem %s1716_s11, 128  ;;  %p2851_p3 = scmp.lt.s32.totalorder %s1716_s11, %s1716_s11 }
  0xfe   :  { %2692 = vmatpush3.bf16.msra.mxu0 %v2691_v36  ;;  %v2743_v36 = vpack.c.bf16 %v527_v28, %v526_v27  ;;  %p2847_p2 = scmp.ne.s32.totalorder %s1716_s11, %s2846_s12  ;;  %p2852_p4 = scmp.lt.s32.totalorder %s2846_s12, %s2846_s12 }
  0xff   :  { %2694 = vmatprep.subr.bf16.mxu0 %v2693_v38  ;;  %v2745_v38 = vpack.c.bf16 %v545_v33, %v544_v32 }
 0x100   :  { %2724 = vmatpush3.bf16.msra.mxu1 %v2723_v37  ;;  %v2775_v37 = vpack.c.bf16 %v559_v31, %v558_v29  ;;  %v2761_v29 = vpack.c.bf16 %v553_v18, %v552_v17  ;;  %v537_v31 = vld [vmem:[#allocation6 + $0xe78] sm:$0xff]  ;;  %p2853_p5 = por %p2852_p4, %p2851_p3 }
 0x101   :  { %2726 = vmatprep.subr.bf16.mxu1 %v2725_v42  ;;  %v2777_v42 = vpack.c.bf16 %v577_v35, %v576_v34  ;;  %v568_v34 = vld [vmem:[#allocation6 + $0xf70] sm:$0xff]  ;;  %v569_v35 = vld [vmem:[#allocation6 + $0xf78] sm:$0xff] }
 0x102   :  { %2696 = vmatpush3.bf16.msra.mxu0 %v2695_v48  ;;  %v2747_v48 = vpack.c.bf16 %v529_v40, %v528_v39  ;;  %v70_v39 = vld [vmem:[#allocation3 + $0xe0] sm:$0xff]  ;;  %v72_v40 = vld [vmem:[#allocation3 + $0xf0] sm:$0xff]  ;;  %p2854_p6 = pnand %p2853_p5, %p2847_p2 }
 0x103   :  { %2698 = vmatprep.subr.bf16.mxu0 %v2697_v50  ;;  %v2749_v50 = vpack.c.bf16 %v547_v45, %v546_v44 }
 0x104   :  { %2728 = vmatpush3.bf16.msra.mxu1 %v2727_v49  ;;  %v2779_v49 = vpack.c.bf16 %v561_v43, %v560_v41 }
 0x105   :  { %2730 = vmatprep.subr.bf16.mxu1 %v2729_v54  ;;  %v2781_v54 = vpack.c.bf16 %v579_v47, %v578_v46 }
 0x106   :  { %2700 = vmatpush3.bf16.msra.mxu0 %v2699_v60  ;;  %v2751_v60 = vpack.c.bf16 %v531_v52, %v530_v51 }
 0x107   :  { %2734 = vmatprep.subr.bf16.mxu0 %v2733_v62  ;;  %v2753_v62 = vpack.c.bf16 %v549_v57, %v548_v56 }
 0x108   :  { %2732 = vmatpush3.bf16.msra.mxu1 %v2731_v61  ;;  %v2783_v61 = vpack.c.bf16 %v563_v55, %v562_v53 }
 0x109   :  { %2766 = vmatprep.subr.bf16.mxu1 %v2765_v2  ;;  %1493 = vmatmul.mubr.f32.vlgmr.msra.gmra.mrb[12].mxu0 %v66_v8  ;;  %v2785_v2 = vpack.c.bf16 %v581_v59, %v580_v58  ;;  %v2755_v8 = vpack.c.bf16 %v533_v0, %v532_v63 }
 0x10a   :  { %2736 = vmatpush3.bf16.msra.mxu0 %v2735_v9  ;;  %1632 = vmatprep.mubr.f32.mxu0 %v71_v22  ;;  %v2787_v9 = vpack.c.bf16 %v565_v3, %v564_v1  ;;  %v584_v22 = vld [vmem:[#allocation6 + $0xff0] sm:$0xff] }
 0x10b   :  { %1563 = vmatmul.mubr.f32.vlgmr.msra.gmra.mrb[12].mxu1 %v68_v10  ;;  %2738 = vmatprep.subr.bf16.mxu0 %v2737_v12  ;;  %v2757_v10 = vpack.c.bf16 %v551_v5, %v550_v4  ;;  %v535_v12 = vld [vmem:[#allocation6 + $0xe68] sm:$0xff] }
 0x10c   :  { %2768 = vmatpush3.bf16.msra.mxu1 %v2767_v11  ;;  %1702 = vmatprep.mubr.f32.mxu1 %v73_v24  ;;  %v534_v11 = vld [vmem:[#allocation6 + $0xe60] sm:$0xff] }
 0x10d   :  { %2770 = vmatprep.subr.bf16.mxu1 %v2769_v16  ;;  %v567_v16 = vld [vmem:[#allocation6 + $0xf68] sm:$0xff] }
 0x10e   :  { %2740 = vmatpush3.bf16.msra.mxu0 %v2739_v23  ;;  %v585_v23 = vld [vmem:[#allocation6 + $0xff8] sm:$0xff]  ;;  %v2791_v28 = vpack.c.bf16 %v567_v16, %v566_v13 }
 0x10f   :  { %2742 = vmatprep.subr.bf16.mxu0 %v2741_v26  ;;  %v2759_v26 = vpack.c.bf16 %v535_v12, %v534_v11  ;;  %v2793_v33 = vpack.c.bf16 %v585_v23, %v584_v22 }
 0x110   :  { %2772 = vmatpush3.bf16.msra.mxu1 %v2771_v25 }
 0x111   :  { %2774 = vmatprep.subr.bf16.mxu1 %v2773_v30  ;;  %v536_v30 = vld [vmem:[#allocation6 + $0xe70] sm:$0xff] }
 0x112   :  { %2744 = vmatpush3.bf16.msra.mxu0 %v2743_v36 }
 0x113   :  { %2746 = vmatprep.subr.bf16.mxu0 %v2745_v38  ;;  %v2795_v38 = vpack.c.bf16 %v569_v35, %v568_v34 }
 0x114   :  { %2776 = vmatpush3.bf16.msra.mxu1 %v2775_v37  ;;  %v2763_v37 = vpack.c.bf16 %v537_v31, %v536_v30 }
 0x115   :  { %2778 = vmatprep.subr.bf16.mxu1 %v2777_v42 }
 0x116   :  { %2748 = vmatpush3.bf16.msra.mxu0 %v2747_v48 }
 0x117   :  { %2750 = vmatprep.subr.bf16.mxu0 %v2749_v50 }
 0x118   :  { %2780 = vmatpush3.bf16.msra.mxu1 %v2779_v49 }
 0x119   :  { %2782 = vmatprep.subr.bf16.mxu1 %v2781_v54 }
 0x11a   :  { %2752 = vmatpush3.bf16.msra.mxu0 %v2751_v60 }
 0x11b   :  { %2754 = vmatprep.subr.bf16.mxu0 %v2753_v62 }
 0x11c   :  { %2784 = vmatpush3.bf16.msra.mxu1 %v2783_v61  ;;  %v1757_v14 = vpop.f32.mrb[0].mxu0 }
 0x11d   :  { %2786 = vmatprep.subr.bf16.mxu1 %v2785_v2  ;;  %v1758_v20 = vpop.f32.mrb[1].mxu0 }
 0x11e   :  { %v1792_v21 = vpop.f32.mrb[0].mxu1  ;;  %v1759_v24 = vadd.f32 %v1758_v20, %v1757_v14  ;;  %2756 = vmatpush3.bf16.msra.mxu0 %v2755_v8 }
 0x11f   :  { %v1793_v25 = vpop.f32.mrb[1].mxu1  ;;  %2758 = vmatprep.subr.bf16.mxu0 %v2757_v10 }
 0x120   :  { %v1794_v27 = vadd.f32 %v1793_v25, %v1792_v21  ;;  %2788 = vmatpush3.bf16.msra.mxu1 %v2787_v9  ;;  %v655_v32 = vadd.f32 %v1759_v24, %v587_v19 }
 0x121   :  { %2790 = vmatprep.subr.bf16.mxu1 %v2789_v15 }
 0x122   :  { %v725_v36 = vadd.f32 %v1794_v27, %v655_v32  ;;  %2760 = vmatpush3.bf16.msra.mxu0 %v2759_v26 }
 0x123   :  { %2762 = vmatprep.subr.bf16.mxu0 %v2761_v29 }
 0x124   :  { %2792 = vmatpush3.bf16.msra.mxu1 %v2791_v28 }
 0x125   :  { %2794 = vmatprep.subr.bf16.mxu1 %v2793_v33 }
 0x126   :  { %2764 = vmatpush3.bf16.msra.mxu0 %v2763_v37 }
 0x128   :  { %2796 = vmatpush3.bf16.msra.mxu1 %v2795_v38 }
 0x129   :  { %1633 = vmatmul.mubr.f32.vlgmr.msra.gmra.mrb[14].mxu0 %v70_v39 }
 0x12b   :  { %1703 = vmatmul.mubr.f32.vlgmr.msra.gmra.mrb[14].mxu1 %v72_v40 }
 0x13c   :  { %v1827_v41 = vpop.f32.mrb[2].mxu0 }
 0x13d   :  { %v1828_v42 = vpop.f32.mrb[3].mxu0 }
 0x13e   :  { %v1862_v43 = vpop.f32.mrb[2].mxu1  ;;  %v1829_v44 = vadd.f32 %v1828_v42, %v1827_v41 }
 0x13f   :  { %v1863_v45 = vpop.f32.mrb[3].mxu1 }
 0x140   :  { %v1864_v46 = vadd.f32 %v1863_v45, %v1862_v43  ;;  %v795_v47 = vadd.f32 %v1829_v44, %v725_v36 }
 0x142   :  { %v865_v48 = vadd.f32 %v1864_v46, %v795_v47 }
 0x15c   :  { %v1897_v49 = vpop.f32.mrb[4].mxu0 }
 0x15d   :  { %v1898_v50 = vpop.f32.mrb[5].mxu0 }
 0x15e   :  { %v1932_v51 = vpop.f32.mrb[4].mxu1  ;;  %v1899_v52 = vadd.f32 %v1898_v50, %v1897_v49 }
 0x15f   :  { %v1933_v53 = vpop.f32.mrb[5].mxu1 }
 0x160   :  { %v1934_v54 = vadd.f32 %v1933_v53, %v1932_v51  ;;  %v935_v55 = vadd.f32 %v1899_v52, %v865_v48 }
 0x162   :  { %v1005_v56 = vadd.f32 %v1934_v54, %v935_v55 }
 0x17c   :  { %v1967_v57 = vpop.f32.mrb[6].mxu0 }
 0x17d   :  { %v1968_v58 = vpop.f32.mrb[7].mxu0 }
 0x17e   :  { %v2002_v59 = vpop.f32.mrb[6].mxu1  ;;  %v1969_v60 = vadd.f32 %v1968_v58, %v1967_v57 }
 0x17f   :  { %v2003_v61 = vpop.f32.mrb[7].mxu1 }
 0x180   :  { %v2004_v62 = vadd.f32 %v2003_v61, %v2002_v59  ;;  %v1075_v63 = vadd.f32 %v1969_v60, %v1005_v56 }
 0x182   :  { %v1145_v0 = vadd.f32 %v2004_v62, %v1075_v63 }
 0x19c   :  { %v2037_v1 = vpop.f32.mrb[8].mxu0 }
 0x19d   :  { %v2038_v2 = vpop.f32.mrb[9].mxu0 }
 0x19e   :  { %v2072_v3 = vpop.f32.mrb[8].mxu1  ;;  %v2039_v4 = vadd.f32 %v2038_v2, %v2037_v1 }
 0x19f   :  { %v2073_v5 = vpop.f32.mrb[9].mxu1 }
 0x1a0   :  { %v2074_v6 = vadd.f32 %v2073_v5, %v2072_v3  ;;  %v1215_v7 = vadd.f32 %v2039_v4, %v1145_v0 }
 0x1a2   :  { %v1285_v8 = vadd.f32 %v2074_v6, %v1215_v7 }
 0x1bc   :  { %v2107_v9 = vpop.f32.mrb[10].mxu0 }
 0x1bd   :  { %v2108_v10 = vpop.f32.mrb[11].mxu0 }
 0x1be   :  { %v2142_v11 = vpop.f32.mrb[10].mxu1  ;;  %v2109_v12 = vadd.f32 %v2108_v10, %v2107_v9 }
 0x1bf   :  { %v2143_v13 = vpop.f32.mrb[11].mxu1 }
 0x1c0   :  { %v2144_v14 = vadd.f32 %v2143_v13, %v2142_v11  ;;  %v1355_v15 = vadd.f32 %v2109_v12, %v1285_v8 }
 0x1c2   :  { %v1425_v16 = vadd.f32 %v2144_v14, %v1355_v15 }
 0x1dc   :  { %v2177_v17 = vpop.f32.mrb[12].mxu0 }
 0x1dd   :  { %v2178_v18 = vpop.f32.mrb[13].mxu0 }
 0x1de   :  { %v2212_v19 = vpop.f32.mrb[12].mxu1  ;;  %v2179_v20 = vadd.f32 %v2178_v18, %v2177_v17 }
 0x1df   :  { %v2213_v21 = vpop.f32.mrb[13].mxu1 }
 0x1e0   :  { %v2214_v22 = vadd.f32 %v2213_v21, %v2212_v19  ;;  %v1495_v23 = vadd.f32 %v2179_v20, %v1425_v16 }
 0x1e2   :  { %v1565_v24 = vadd.f32 %v2214_v22, %v1495_v23 }
 0x1fc   :  { %v2247_v25 = vpop.f32.mrb[14].mxu0 }
 0x1fd   :  { %v2248_v26 = vpop.f32.mrb[15].mxu0 }
 0x1fe   :  { %v2282_v27 = vpop.f32.mrb[14].mxu1  ;;  %v2249_v28 = vadd.f32 %v2248_v26, %v2247_v25 }
 0x1ff   :  { %v2283_v29 = vpop.f32.mrb[15].mxu1 }
 0x200   :  { %v2284_v30 = vadd.f32 %v2283_v29, %v2282_v27  ;;  %v1635_v31 = vadd.f32 %v2249_v28, %v1565_v24 }
 0x202   :  { %v1705_v32 = vadd.f32 %v2284_v30, %v1635_v31 }
 0x204   :  { %1708 = vst [vmem:[#allocation8] sm:$0xff] %v1705_v32 }
 0x205   :  { %2857 = shalt.err (!%p2854_p6)
}
 0x206   :  { %s2858_s15 = scalar_lea.hbm %s2948_s3, 128 }
 0x207   :  { %p2859_p7 = scmp.ne.s32.totalorder %s2948_s3, %s2858_s15  ;;  %p2862_p8 = scmp.lt.u32.totalorder %s2858_s15, %s2948_s3 }
 0x209   :  { %p2864_p9 = pnand %p2862_p8, %p2859_p7 }
 0x20b   :  { %2867 = shalt.err (!%p2864_p9)
}
 0x20c   :  { %1718 = dma.vmem_to_hbm [thread:$0]  %s1716_s11, 128, %s2948_s3, [#allocation5]  }
 0x20d   :  { %2872 = dma.done.wait [#allocation5], 128  }
 0x20e   :  { %2873 = vsyncadd [#allocation5], 4294967168 }
 0x20f   :  { %1722 = vsyncpa [#allocation4], 1 }
 0x210   :  { %1723 = vsyncpa [#allocation7], 1 }
 0x211   :  { %1724 = vsyncpa [#allocation5], 1 }

</bundles_post_ra>
